<compile_context>
chip_gen: v7x
topology: tpu7x:2x2x1
jax: 0.10.0
libtpu: 0.0.40
codegen_flags: <defaults>
</compile_context>

<pallas_src>
import functools

import numpy as np

import jax
import jax.numpy as jnp
from jax.experimental import pallas as pl
from jax.experimental.pallas import tpu as pltpu

BN_EPS = 1e-5
_NUM_CLASSES = 2

# (H, W, Cin, Cout, KH, KW, stride, pad) per conv block, for 16x16 input.
_LAYER_CFG = (
    (16, 16, 1, 8, 5, 5, 2, 2),   # 16x16 -> 8x8
    (8, 8, 8, 16, 3, 3, 2, 1),    # 8x8  -> 4x4
    (4, 4, 16, 32, 3, 3, 2, 1),   # 4x4  -> 2x2
    (2, 2, 32, 64, 3, 3, 2, 1),   # 2x2  -> 1x1
)
_LAYER_OHW = tuple(
    (((H + 2 * p - KH) // s + 1) * ((W + 2 * p - KW) // s + 1))
    for (H, W, _, _, KH, KW, s, p) in _LAYER_CFG
)                                                    # (64, 16, 4, 1)
_COUT = tuple(cfg[3] for cfg in _LAYER_CFG)          # (8, 16, 32, 64)
_KIN = tuple(c[0] * c[1] * c[2] for c in _LAYER_CFG)  # (256, 512, 256, 128)
_KOUT = tuple(o * c for o, c in zip(_LAYER_OHW, _COUT))  # (512, 256, 128, 64)

# ---- packed-constant layouts (all slices are static) ------------------------
# wbuf: bf16 (512, 768) holding the dense conv matrices M1..M4.
_WBUF_SHAPE = (512, 768)
_W_SLOT = (
    (0, 256, 0, 512),      # M1 (256, 512)
    (0, 512, 512, 768),    # M2 (512, 256)
    (256, 512, 0, 128),    # M3 (256, 128)
    (256, 384, 128, 192),  # M4 (128, 64)
)
# cwide: f32 (64, 512): per-layer bias rows, linear bias row, PT1..PT3.
_CWIDE_SHAPE = (64, 512)
_BB_ROW = (0, 1, 2, 3)     # bias row for layer l, width _KOUT[l]
_BLIN_ROW = 4              # linear bias, width _NUM_CLASSES
_PT_SLOT = (
    (8, 16, 0, 512),       # PT1 (8, 512)
    (16, 32, 0, 256),      # PT2 (16, 256)
    (32, 64, 0, 128),      # PT3 (32, 128)
)
# cnarrow: f32 (512, 64): P1..P3 reduce matrices + linear weight.
_CNARROW_SHAPE = (512, 64)
_P_SLOT = (
    (0, 512, 0, 8),        # P1 (512, 8)
    (0, 256, 8, 24),       # P2 (256, 16)
    (0, 128, 24, 56),      # P3 (128, 32)
)
_WLIN_SLOT = (0, 64, 56, 58)   # (64, 2)


def _carve(ref, slot):
    r0, r1, c0, c1 = slot
    return ref[r0:r1, c0:c1]


# ----------------------------------------------------------------------------
# Fused Pallas kernel: whole forward pass in one call
# ----------------------------------------------------------------------------
def fused_forward_kernel(x_ref, w_ref, cw_ref, cn_ref, o_ref, *, batch):
    def conv_relu_bn(a, m, bb, p, pt, ohw):
        # Conv2d (padding/stride/im2col folded into one dense bf16 matmul, f32
        # accumulation) + bias + ReLU.
        y = jnp.dot(a.astype(jnp.bfloat16), m,
                    preferred_element_type=jnp.float32) + bb      # (N, ohw*C)
        z = jnp.maximum(y, 0.0)

        # BatchNorm2d, training-mode batch stats (gamma=1, beta=0), biased
        # variance, one merged reduction: [colsum; colsumsq] @ P.
        inv_cnt = 1.0 / float(batch * ohw)
        stats = jnp.concatenate(
            [jnp.sum(z, axis=0, keepdims=True),
             jnp.sum(z * z, axis=0, keepdims=True)], axis=0)      # (2, ohw*C)
        if ohw == 1:
            red = stats * inv_cnt                                 # (2, C)
        else:
            red = jnp.dot(stats, p,
                          preferred_element_type=jnp.float32) * inv_cnt
        mu, ez2 = red[0:1, :], red[1:2, :]
        var = jnp.maximum(ez2 - mu * mu, 0.0)      # guard f32 cancellation
        scale = jax.lax.rsqrt(var + BN_EPS)        # EUP (near free)
        shift = -mu * scale
        ss = jnp.concatenate([scale, shift], axis=0)              # (2, C)
        if ohw != 1:
            # Broadcast per-channel scale/shift back to (2, ohw*C) via PT
            # (one merged MXU op per layer; skipped entirely for 1x1 spatial).
            ss = jnp.dot(ss, pt, preferred_element_type=jnp.float32)
        return z * ss[0:1, :] + ss[1:2, :]

    a = x_ref[...]                                                # (N, 256) f32
    a = conv_relu_bn(a, _carve(w_ref, _W_SLOT[0]),
                     cw_ref[_BB_ROW[0]:_BB_ROW[0] + 1, 0:_KOUT[0]],
                     _carve(cn_ref, _P_SLOT[0]), _carve(cw_ref, _PT_SLOT[0]),
                     _LAYER_OHW[0])
    a = conv_relu_bn(a, _carve(w_ref, _W_SLOT[1]),
                     cw_ref[_BB_ROW[1]:_BB_ROW[1] + 1, 0:_KOUT[1]],
                     _carve(cn_ref, _P_SLOT[1]), _carve(cw_ref, _PT_SLOT[1]),
                     _LAYER_OHW[1])
    a = conv_relu_bn(a, _carve(w_ref, _W_SLOT[2]),
                     cw_ref[_BB_ROW[2]:_BB_ROW[2] + 1, 0:_KOUT[2]],
                     _carve(cn_ref, _P_SLOT[2]), _carve(cw_ref, _PT_SLOT[2]),
                     _LAYER_OHW[2])
    a = conv_relu_bn(a, _carve(w_ref, _W_SLOT[3]),
                     cw_ref[_BB_ROW[3]:_BB_ROW[3] + 1, 0:_KOUT[3]],
                     None, None, _LAYER_OHW[3])

    # AdaptiveAvgPool2d(1): layer-4 output is 1x1 spatially -> identity.
    pooled = a                                                    # (N, 64)

    # Linear(64 -> 2)
    w_lin = _carve(cn_ref, _WLIN_SLOT)                            # (64, 2)
    b_lin = cw_ref[_BLIN_ROW:_BLIN_ROW + 1, 0:_NUM_CLASSES]       # (1, 2)
    o_ref[...] = jnp.dot(pooled, w_lin,
                         preferred_element_type=jnp.float32) + b_lin


# ----------------------------------------------------------------------------
# One-time weight lowering: fold each conv into a dense matrix, pack buffers
# ----------------------------------------------------------------------------
def _conv_selector(H, W, Cin, KH, KW, stride, pad):
    """0/1 tensor T[i, k, o] = 1 iff flattened input element i feeds patch
    element k of output spatial position o (padding handled by omission)."""
    OH = (H + 2 * pad - KH) // stride + 1
    OW = (W + 2 * pad - KW) // stride + 1
    T = np.zeros((H * W * Cin, KH * KW * Cin, OH * OW), np.float32)
    for oh in range(OH):
        for ow in range(OW):
            o = oh * OW + ow
            for ki in range(KH):
                hi = stride * oh + ki - pad
                if hi < 0 or hi >= H:
                    continue
                for kj in range(KW):
                    wi = stride * ow + kj - pad
                    if wi < 0 or wi >= W:
                        continue
                    i0 = (hi * W + wi) * Cin
                    k0 = (ki * KW + kj) * Cin
                    for ci in range(Cin):
                        T[i0 + ci, k0 + ci, o] = 1.0
    return T, OH, OW


def lower_params(params):
    """Convert conv weights into the packed per-call constant buffers consumed
    by the fused kernel.  Done once per parameter set (not on the hot path)."""
    wbuf = np.zeros(_WBUF_SHAPE, np.float32)
    cwide = np.zeros(_CWIDE_SHAPE, np.float32)
    cnarrow = np.zeros(_CNARROW_SHAPE, np.float32)

    for idx, (H, W, Cin, Cout, KH, KW, s, p) in enumerate(_LAYER_CFG):
        w = np.asarray(params[f"w{idx + 1}"], np.float32)   # (KH, KW, Cin, Cout)
        b = np.asarray(params[f"b{idx + 1}"], np.float32)   # (Cout,)
        T, OH, OW = _conv_selector(H, W, Cin, KH, KW, s, p)
        w2d = w.reshape(KH * KW * Cin, Cout)
        # M[i, o*Cout + c] = sum_k T[i, k, o] * w2d[k, c]
        M = np.einsum("iko,kc->ioc", T, w2d).reshape(H * W * Cin,
                                                     OH * OW * Cout)
        r0, r1, c0, c1 = _W_SLOT[idx]
        assert M.shape == (r1 - r0, c1 - c0)
        wbuf[r0:r1, c0:c1] = M
        # Bias pre-broadcast to a lane-dense row (channel-minor layout).
        cwide[_BB_ROW[idx], 0:OH * OW * Cout] = np.tile(b, OH * OW)
        if OH * OW > 1:
            # Per-channel reduce (P) and broadcast (PT) constant matrices.
            P = np.tile(np.eye(Cout, dtype=np.float32), (OH * OW, 1))
            pr0, pr1, pc0, pc1 = _P_SLOT[idx]
            cnarrow[pr0:pr1, pc0:pc1] = P
            tr0, tr1, tc0, tc1 = _PT_SLOT[idx]
            cwide[tr0:tr1, tc0:tc1] = P.T

    cwide[_BLIN_ROW, 0:_NUM_CLASSES] = np.asarray(params["b_lin"],
                                                  np.float32).reshape(-1)
    lr0, lr1, lc0, lc1 = _WLIN_SLOT
    cnarrow[lr0:lr1, lc0:lc1] = np.asarray(params["w_lin"], np.float32)

    return {
        "wbuf": jnp.asarray(wbuf, dtype=jnp.bfloat16),   # 768 KiB, one DMA
        "cwide": jnp.asarray(cwide),                     # 128 KiB
        "cnarrow": jnp.asarray(cnarrow),                 # 128 KiB
    }


# ----------------------------------------------------------------------------
# Forward pass: exactly one pallas_call per inference
# ----------------------------------------------------------------------------
@jax.jit
def audio_classifier_forward(lowered, x_nchw):
    N = x_nchw.shape[0]
    H, W, Cin = _LAYER_CFG[0][0], _LAYER_CFG[0][1], _LAYER_CFG[0][2]
    # NCHW -> NHWC -> flatten (h, w, c); the only wrapper-side data movement.
    x = jnp.transpose(x_nchw.astype(jnp.float32), (0, 2, 3, 1)).reshape(
        N, H * W * Cin)

    vmem = pl.BlockSpec(memory_space=pltpu.MemorySpace.VMEM)
    kern = functools.partial(fused_forward_kernel, batch=N)
    return pl.pallas_call(
        kern,
        out_shape=jax.ShapeDtypeStruct((N, _NUM_CLASSES), jnp.float32),
        in_specs=[vmem, vmem, vmem, vmem],
        out_specs=vmem,
        compiler_params=pltpu.CompilerParams(
            vmem_limit_bytes=16 * 1024 * 1024),  # total footprint ~1.2 MiB
    )(x, lowered["wbuf"], lowered["cwide"], lowered["cnarrow"])


# ----------------------------------------------------------------------------
# Parameter initialization (matches module __init__ shapes / distributions)
# ----------------------------------------------------------------------------
def kaiming_normal(key, kh, kw, cin, cout, a=0.1):
    fan_in = cin * kh * kw
    gain = jnp.sqrt(2.0 / (1.0 + a * a))
    std = gain / jnp.sqrt(fan_in)
    return std * jax.random.normal(key, (kh, kw, cin, cout), dtype=jnp.float32)


def init_params(key):
    ks = jax.random.split(key, 6)
    return {
        # conv weights as (KH, KW, Cin, Cout); biases zero (as in the module)
        "w1": kaiming_normal(ks[0], 5, 5, 1, 8),
        "b1": jnp.zeros((8,), jnp.float32),
        "w2": kaiming_normal(ks[1], 3, 3, 8, 16),
        "b2": jnp.zeros((16,), jnp.float32),
        "w3": kaiming_normal(ks[2], 3, 3, 16, 32),
        "b3": jnp.zeros((32,), jnp.float32),
        "w4": kaiming_normal(ks[3], 3, 3, 32, 64),
        "b4": jnp.zeros((64,), jnp.float32),
        # Linear(64 -> 2): PyTorch default uniform(-1/sqrt(64), 1/sqrt(64))
        "w_lin": jax.random.uniform(
            ks[4], (64, _NUM_CLASSES), jnp.float32,
            minval=-1.0 / 8.0, maxval=1.0 / 8.0),
        "b_lin": jax.random.uniform(
            ks[5], (_NUM_CLASSES,), jnp.float32,
            minval=-1.0 / 8.0, maxval=1.0 / 8.0),
    }


if __name__ == "__main__":
    key = jax.random.PRNGKey(0)
    k_param, k_input = jax.random.split(key)
    params = init_params(k_param)
    lowered = lower_params(params)        # one-time weight prep (not hot path)

    # Input matches Conv2d(1, ...) channel convention: NCHW = (2, 1, 16, 16)
    x = jax.random.normal(k_input, (2, 1, 16, 16), dtype=jnp.float32)

    out = audio_classifier_forward(lowered, x)
    out = jax.block_until_ready(out)
    assert out.shape == (2, _NUM_CLASSES), out.shape
    print("KERNEL_OK")
</pallas_src>

<mosaic_0001>
module attributes {stable_mosaic.version = 11 : i64} {
  func.func @fused_forward_kernel(%arg0: memref<2x256xf32, #tpu.memory_space<vmem>>, %arg1: memref<512x768xbf16, #tpu.memory_space<vmem>>, %arg2: memref<64x512xf32, #tpu.memory_space<vmem>>, %arg3: memref<512x64xf32, #tpu.memory_space<vmem>>, %arg4: memref<2x2xf32, #tpu.memory_space<vmem>>) attributes {dimension_semantics = [], scalar_prefetch = 0 : i64, scratch_operands = 0 : i64, tpu.core_type = #tpu.core_type<tc>} {
    %c0 = arith.constant 0 : index
    %c0_0 = arith.constant 0 : index
    %0 = vector.load %arg0[%c0, %c0_0] : memref<2x256xf32, #tpu.memory_space<vmem>>, vector<2x256xf32>
    %c0_1 = arith.constant 0 : index
    %c0_2 = arith.constant 0 : index
    %1 = vector.load %arg1[%c0_1, %c0_2] : memref<512x768xbf16, #tpu.memory_space<vmem>>, vector<256x512xbf16>
    %c0_3 = arith.constant 0 : index
    %c0_4 = arith.constant 0 : index
    %2 = vector.load %arg2[%c0_3, %c0_4] : memref<64x512xf32, #tpu.memory_space<vmem>>, vector<1x512xf32>
    %c0_5 = arith.constant 0 : index
    %c0_6 = arith.constant 0 : index
    %3 = vector.load %arg3[%c0_5, %c0_6] : memref<512x64xf32, #tpu.memory_space<vmem>>, vector<512x8xf32>
    %c8 = arith.constant 8 : index
    %c0_7 = arith.constant 0 : index
    %4 = vector.load %arg2[%c8, %c0_7] : memref<64x512xf32, #tpu.memory_space<vmem>>, vector<8x512xf32>
    %5 = arith.truncf %0 : vector<2x256xf32> to vector<2x256xbf16>
    %cst = arith.constant dense<0.000000e+00> : vector<2x512xf32>
    %6 = tpu.matmul %5, %1, %cst {dimension_numbers = #tpu.dot_dimension_numbers<[1], [0], [0], [1], [0, 0, 1, 1], [], []>} : vector<2x256xbf16>, vector<256x512xbf16>, vector<2x512xf32> -> vector<2x512xf32>
    %7 = vector.broadcast %2 : vector<1x512xf32> to vector<2x512xf32>
    %8 = arith.addf %6, %7 : vector<2x512xf32>
    %cst_8 = arith.constant 0.000000e+00 : f32
    %9 = vector.broadcast %cst_8 : f32 to vector<2x512xf32>
    %10 = arith.maximumf %8, %9 : vector<2x512xf32>
    %cst_9 = arith.constant dense<0.000000e+00> : vector<512xf32>
    %11 = vector.multi_reduction <add>, %10, %cst_9 [0] : vector<2x512xf32> to vector<512xf32>
    %12 = vector.shape_cast %11 : vector<512xf32> to vector<1x512xf32>
    %13 = arith.mulf %10, %10 : vector<2x512xf32>
    %cst_10 = arith.constant dense<0.000000e+00> : vector<512xf32>
    %14 = vector.multi_reduction <add>, %13, %cst_10 [0] : vector<2x512xf32> to vector<512xf32>
    %15 = vector.shape_cast %14 : vector<512xf32> to vector<1x512xf32>
    %16 = tpu.concatenate %12, %15 in 0 : vector<1x512xf32>, vector<1x512xf32> -> vector<2x512xf32>
    %cst_11 = arith.constant dense<0.000000e+00> : vector<2x8xf32>
    %17 = tpu.matmul %16, %3, %cst_11 {dimension_numbers = #tpu.dot_dimension_numbers<[1], [0], [0], [1], [0, 0, 1, 1], [], []>} : vector<2x512xf32>, vector<512x8xf32>, vector<2x8xf32> -> vector<2x8xf32>
    %cst_12 = arith.constant 7.812500e-03 : f32
    %18 = vector.broadcast %cst_12 : f32 to vector<2x8xf32>
    %19 = arith.mulf %17, %18 : vector<2x8xf32>
    %20 = vector.extract_strided_slice %19 {offsets = [0, 0], sizes = [1, 8], strides = [1, 1]} : vector<2x8xf32> to vector<1x8xf32>
    %21 = vector.extract_strided_slice %19 {offsets = [1, 0], sizes = [1, 8], strides = [1, 1]} : vector<2x8xf32> to vector<1x8xf32>
    %22 = arith.mulf %20, %20 : vector<1x8xf32>
    %23 = arith.subf %21, %22 : vector<1x8xf32>
    %cst_13 = arith.constant 0.000000e+00 : f32
    %24 = vector.broadcast %cst_13 : f32 to vector<1x8xf32>
    %25 = arith.maximumf %23, %24 : vector<1x8xf32>
    %cst_14 = arith.constant 9.99999974E-6 : f32
    %26 = vector.broadcast %cst_14 : f32 to vector<1x8xf32>
    %27 = arith.addf %25, %26 : vector<1x8xf32>
    %28 = math.rsqrt %27 : vector<1x8xf32>
    %cst_15 = arith.constant 0.000000e+00 : f32
    %29 = vector.broadcast %cst_15 : f32 to vector<1x8xf32>
    %30 = arith.subf %29, %20 : vector<1x8xf32>
    %31 = arith.mulf %30, %28 : vector<1x8xf32>
    %32 = tpu.concatenate %28, %31 in 0 : vector<1x8xf32>, vector<1x8xf32> -> vector<2x8xf32>
    %cst_16 = arith.constant dense<0.000000e+00> : vector<2x512xf32>
    %33 = tpu.matmul %32, %4, %cst_16 {dimension_numbers = #tpu.dot_dimension_numbers<[1], [0], [0], [1], [0, 0, 1, 1], [], []>} : vector<2x8xf32>, vector<8x512xf32>, vector<2x512xf32> -> vector<2x512xf32>
    %34 = vector.extract_strided_slice %33 {offsets = [0, 0], sizes = [1, 512], strides = [1, 1]} : vector<2x512xf32> to vector<1x512xf32>
    %35 = vector.broadcast %34 : vector<1x512xf32> to vector<2x512xf32>
    %36 = arith.mulf %10, %35 : vector<2x512xf32>
    %37 = vector.extract_strided_slice %33 {offsets = [1, 0], sizes = [1, 512], strides = [1, 1]} : vector<2x512xf32> to vector<1x512xf32>
    %38 = vector.broadcast %37 : vector<1x512xf32> to vector<2x512xf32>
    %39 = arith.addf %36, %38 : vector<2x512xf32>
    %c0_17 = arith.constant 0 : index
    %c512 = arith.constant 512 : index
    %40 = vector.load %arg1[%c0_17, %c512] : memref<512x768xbf16, #tpu.memory_space<vmem>>, vector<512x256xbf16>
    %c1 = arith.constant 1 : index
    %c0_18 = arith.constant 0 : index
    %41 = vector.load %arg2[%c1, %c0_18] : memref<64x512xf32, #tpu.memory_space<vmem>>, vector<1x256xf32>
    %c0_19 = arith.constant 0 : index
    %c8_20 = arith.constant 8 : index
    %42 = vector.load %arg3[%c0_19, %c8_20] : memref<512x64xf32, #tpu.memory_space<vmem>>, vector<256x16xf32>
    %c16 = arith.constant 16 : index
    %c0_21 = arith.constant 0 : index
    %43 = vector.load %arg2[%c16, %c0_21] : memref<64x512xf32, #tpu.memory_space<vmem>>, vector<16x256xf32>
    %44 = arith.truncf %39 : vector<2x512xf32> to vector<2x512xbf16>
    %cst_22 = arith.constant dense<0.000000e+00> : vector<2x256xf32>
    %45 = tpu.matmul %44, %40, %cst_22 {dimension_numbers = #tpu.dot_dimension_numbers<[1], [0], [0], [1], [0, 0, 1, 1], [], []>} : vector<2x512xbf16>, vector<512x256xbf16>, vector<2x256xf32> -> vector<2x256xf32>
    %46 = vector.broadcast %41 : vector<1x256xf32> to vector<2x256xf32>
    %47 = arith.addf %45, %46 : vector<2x256xf32>
    %cst_23 = arith.constant 0.000000e+00 : f32
    %48 = vector.broadcast %cst_23 : f32 to vector<2x256xf32>
    %49 = arith.maximumf %47, %48 : vector<2x256xf32>
    %cst_24 = arith.constant dense<0.000000e+00> : vector<256xf32>
    %50 = vector.multi_reduction <add>, %49, %cst_24 [0] : vector<2x256xf32> to vector<256xf32>
    %51 = vector.shape_cast %50 : vector<256xf32> to vector<1x256xf32>
    %52 = arith.mulf %49, %49 : vector<2x256xf32>
    %cst_25 = arith.constant dense<0.000000e+00> : vector<256xf32>
    %53 = vector.multi_reduction <add>, %52, %cst_25 [0] : vector<2x256xf32> to vector<256xf32>
    %54 = vector.shape_cast %53 : vector<256xf32> to vector<1x256xf32>
    %55 = tpu.concatenate %51, %54 in 0 : vector<1x256xf32>, vector<1x256xf32> -> vector<2x256xf32>
    %cst_26 = arith.constant dense<0.000000e+00> : vector<2x16xf32>
    %56 = tpu.matmul %55, %42, %cst_26 {dimension_numbers = #tpu.dot_dimension_numbers<[1], [0], [0], [1], [0, 0, 1, 1], [], []>} : vector<2x256xf32>, vector<256x16xf32>, vector<2x16xf32> -> vector<2x16xf32>
    %cst_27 = arith.constant 3.125000e-02 : f32
    %57 = vector.broadcast %cst_27 : f32 to vector<2x16xf32>
    %58 = arith.mulf %56, %57 : vector<2x16xf32>
    %59 = vector.extract_strided_slice %58 {offsets = [0, 0], sizes = [1, 16], strides = [1, 1]} : vector<2x16xf32> to vector<1x16xf32>
    %60 = vector.extract_strided_slice %58 {offsets = [1, 0], sizes = [1, 16], strides = [1, 1]} : vector<2x16xf32> to vector<1x16xf32>
    %61 = arith.mulf %59, %59 : vector<1x16xf32>
    %62 = arith.subf %60, %61 : vector<1x16xf32>
    %cst_28 = arith.constant 0.000000e+00 : f32
    %63 = vector.broadcast %cst_28 : f32 to vector<1x16xf32>
    %64 = arith.maximumf %62, %63 : vector<1x16xf32>
    %cst_29 = arith.constant 9.99999974E-6 : f32
    %65 = vector.broadcast %cst_29 : f32 to vector<1x16xf32>
    %66 = arith.addf %64, %65 : vector<1x16xf32>
    %67 = math.rsqrt %66 : vector<1x16xf32>
    %cst_30 = arith.constant 0.000000e+00 : f32
    %68 = vector.broadcast %cst_30 : f32 to vector<1x16xf32>
    %69 = arith.subf %68, %59 : vector<1x16xf32>
    %70 = arith.mulf %69, %67 : vector<1x16xf32>
    %71 = tpu.concatenate %67, %70 in 0 : vector<1x16xf32>, vector<1x16xf32> -> vector<2x16xf32>
    %cst_31 = arith.constant dense<0.000000e+00> : vector<2x256xf32>
    %72 = tpu.matmul %71, %43, %cst_31 {dimension_numbers = #tpu.dot_dimension_numbers<[1], [0], [0], [1], [0, 0, 1, 1], [], []>} : vector<2x16xf32>, vector<16x256xf32>, vector<2x256xf32> -> vector<2x256xf32>
    %73 = vector.extract_strided_slice %72 {offsets = [0, 0], sizes = [1, 256], strides = [1, 1]} : vector<2x256xf32> to vector<1x256xf32>
    %74 = vector.broadcast %73 : vector<1x256xf32> to vector<2x256xf32>
    %75 = arith.mulf %49, %74 : vector<2x256xf32>
    %76 = vector.extract_strided_slice %72 {offsets = [1, 0], sizes = [1, 256], strides = [1, 1]} : vector<2x256xf32> to vector<1x256xf32>
    %77 = vector.broadcast %76 : vector<1x256xf32> to vector<2x256xf32>
    %78 = arith.addf %75, %77 : vector<2x256xf32>
    %c256 = arith.constant 256 : index
    %c0_32 = arith.constant 0 : index
    %79 = vector.load %arg1[%c256, %c0_32] : memref<512x768xbf16, #tpu.memory_space<vmem>>, vector<256x128xbf16>
    %c2 = arith.constant 2 : index
    %c0_33 = arith.constant 0 : index
    %80 = vector.load %arg2[%c2, %c0_33] : memref<64x512xf32, #tpu.memory_space<vmem>>, vector<1x128xf32>
    %c0_34 = arith.constant 0 : index
    %c24 = arith.constant 24 : index
    %81 = vector.load %arg3[%c0_34, %c24] : memref<512x64xf32, #tpu.memory_space<vmem>>, vector<128x32xf32>
    %c32 = arith.constant 32 : index
    %c0_35 = arith.constant 0 : index
    %82 = vector.load %arg2[%c32, %c0_35] : memref<64x512xf32, #tpu.memory_space<vmem>>, vector<32x128xf32>
    %83 = arith.truncf %78 : vector<2x256xf32> to vector<2x256xbf16>
    %cst_36 = arith.constant dense<0.000000e+00> : vector<2x128xf32>
    %84 = tpu.matmul %83, %79, %cst_36 {dimension_numbers = #tpu.dot_dimension_numbers<[1], [0], [0], [1], [0, 0, 1, 1], [], []>} : vector<2x256xbf16>, vector<256x128xbf16>, vector<2x128xf32> -> vector<2x128xf32>
    %85 = vector.broadcast %80 : vector<1x128xf32> to vector<2x128xf32>
    %86 = arith.addf %84, %85 : vector<2x128xf32>
    %cst_37 = arith.constant 0.000000e+00 : f32
    %87 = vector.broadcast %cst_37 : f32 to vector<2x128xf32>
    %88 = arith.maximumf %86, %87 : vector<2x128xf32>
    %cst_38 = arith.constant dense<0.000000e+00> : vector<128xf32>
    %89 = vector.multi_reduction <add>, %88, %cst_38 [0] : vector<2x128xf32> to vector<128xf32>
    %90 = vector.shape_cast %89 : vector<128xf32> to vector<1x128xf32>
    %91 = arith.mulf %88, %88 : vector<2x128xf32>
    %cst_39 = arith.constant dense<0.000000e+00> : vector<128xf32>
    %92 = vector.multi_reduction <add>, %91, %cst_39 [0] : vector<2x128xf32> to vector<128xf32>
    %93 = vector.shape_cast %92 : vector<128xf32> to vector<1x128xf32>
    %94 = tpu.concatenate %90, %93 in 0 : vector<1x128xf32>, vector<1x128xf32> -> vector<2x128xf32>
    %cst_40 = arith.constant dense<0.000000e+00> : vector<2x32xf32>
    %95 = tpu.matmul %94, %81, %cst_40 {dimension_numbers = #tpu.dot_dimension_numbers<[1], [0], [0], [1], [0, 0, 1, 1], [], []>} : vector<2x128xf32>, vector<128x32xf32>, vector<2x32xf32> -> vector<2x32xf32>
    %cst_41 = arith.constant 1.250000e-01 : f32
    %96 = vector.broadcast %cst_41 : f32 to vector<2x32xf32>
    %97 = arith.mulf %95, %96 : vector<2x32xf32>
    %98 = vector.extract_strided_slice %97 {offsets = [0, 0], sizes = [1, 32], strides = [1, 1]} : vector<2x32xf32> to vector<1x32xf32>
    %99 = vector.extract_strided_slice %97 {offsets = [1, 0], sizes = [1, 32], strides = [1, 1]} : vector<2x32xf32> to vector<1x32xf32>
    %100 = arith.mulf %98, %98 : vector<1x32xf32>
    %101 = arith.subf %99, %100 : vector<1x32xf32>
    %cst_42 = arith.constant 0.000000e+00 : f32
    %102 = vector.broadcast %cst_42 : f32 to vector<1x32xf32>
    %103 = arith.maximumf %101, %102 : vector<1x32xf32>
    %cst_43 = arith.constant 9.99999974E-6 : f32
    %104 = vector.broadcast %cst_43 : f32 to vector<1x32xf32>
    %105 = arith.addf %103, %104 : vector<1x32xf32>
    %106 = math.rsqrt %105 : vector<1x32xf32>
    %cst_44 = arith.constant 0.000000e+00 : f32
    %107 = vector.broadcast %cst_44 : f32 to vector<1x32xf32>
    %108 = arith.subf %107, %98 : vector<1x32xf32>
    %109 = arith.mulf %108, %106 : vector<1x32xf32>
    %110 = tpu.concatenate %106, %109 in 0 : vector<1x32xf32>, vector<1x32xf32> -> vector<2x32xf32>
    %cst_45 = arith.constant dense<0.000000e+00> : vector<2x128xf32>
    %111 = tpu.matmul %110, %82, %cst_45 {dimension_numbers = #tpu.dot_dimension_numbers<[1], [0], [0], [1], [0, 0, 1, 1], [], []>} : vector<2x32xf32>, vector<32x128xf32>, vector<2x128xf32> -> vector<2x128xf32>
    %112 = vector.extract_strided_slice %111 {offsets = [0, 0], sizes = [1, 128], strides = [1, 1]} : vector<2x128xf32> to vector<1x128xf32>
    %113 = vector.broadcast %112 : vector<1x128xf32> to vector<2x128xf32>
    %114 = arith.mulf %88, %113 : vector<2x128xf32>
    %115 = vector.extract_strided_slice %111 {offsets = [1, 0], sizes = [1, 128], strides = [1, 1]} : vector<2x128xf32> to vector<1x128xf32>
    %116 = vector.broadcast %115 : vector<1x128xf32> to vector<2x128xf32>
    %117 = arith.addf %114, %116 : vector<2x128xf32>
    %c256_46 = arith.constant 256 : index
    %c128 = arith.constant 128 : index
    %118 = vector.load %arg1[%c256_46, %c128] : memref<512x768xbf16, #tpu.memory_space<vmem>>, vector<128x64xbf16>
    %c3 = arith.constant 3 : index
    %c0_47 = arith.constant 0 : index
    %119 = vector.load %arg2[%c3, %c0_47] : memref<64x512xf32, #tpu.memory_space<vmem>>, vector<1x64xf32>
    %120 = arith.truncf %117 : vector<2x128xf32> to vector<2x128xbf16>
    %cst_48 = arith.constant dense<0.000000e+00> : vector<2x64xf32>
    %121 = tpu.matmul %120, %118, %cst_48 {dimension_numbers = #tpu.dot_dimension_numbers<[1], [0], [0], [1], [0, 0, 1, 1], [], []>} : vector<2x128xbf16>, vector<128x64xbf16>, vector<2x64xf32> -> vector<2x64xf32>
    %122 = vector.broadcast %119 : vector<1x64xf32> to vector<2x64xf32>
    %123 = arith.addf %121, %122 : vector<2x64xf32>
    %cst_49 = arith.constant 0.000000e+00 : f32
    %124 = vector.broadcast %cst_49 : f32 to vector<2x64xf32>
    %125 = arith.maximumf %123, %124 : vector<2x64xf32>
    %cst_50 = arith.constant dense<0.000000e+00> : vector<64xf32>
    %126 = vector.multi_reduction <add>, %125, %cst_50 [0] : vector<2x64xf32> to vector<64xf32>
    %127 = vector.shape_cast %126 : vector<64xf32> to vector<1x64xf32>
    %128 = arith.mulf %125, %125 : vector<2x64xf32>
    %cst_51 = arith.constant dense<0.000000e+00> : vector<64xf32>
    %129 = vector.multi_reduction <add>, %128, %cst_51 [0] : vector<2x64xf32> to vector<64xf32>
    %130 = vector.shape_cast %129 : vector<64xf32> to vector<1x64xf32>
    %131 = tpu.concatenate %127, %130 in 0 : vector<1x64xf32>, vector<1x64xf32> -> vector<2x64xf32>
    %cst_52 = arith.constant 5.000000e-01 : f32
    %132 = vector.broadcast %cst_52 : f32 to vector<2x64xf32>
    %133 = arith.mulf %131, %132 : vector<2x64xf32>
    %134 = vector.extract_strided_slice %133 {offsets = [0, 0], sizes = [1, 64], strides = [1, 1]} : vector<2x64xf32> to vector<1x64xf32>
    %135 = vector.extract_strided_slice %133 {offsets = [1, 0], sizes = [1, 64], strides = [1, 1]} : vector<2x64xf32> to vector<1x64xf32>
    %136 = arith.mulf %134, %134 : vector<1x64xf32>
    %137 = arith.subf %135, %136 : vector<1x64xf32>
    %cst_53 = arith.constant 0.000000e+00 : f32
    %138 = vector.broadcast %cst_53 : f32 to vector<1x64xf32>
    %139 = arith.maximumf %137, %138 : vector<1x64xf32>
    %cst_54 = arith.constant 9.99999974E-6 : f32
    %140 = vector.broadcast %cst_54 : f32 to vector<1x64xf32>
    %141 = arith.addf %139, %140 : vector<1x64xf32>
    %142 = math.rsqrt %141 : vector<1x64xf32>
    %cst_55 = arith.constant 0.000000e+00 : f32
    %143 = vector.broadcast %cst_55 : f32 to vector<1x64xf32>
    %144 = arith.subf %143, %134 : vector<1x64xf32>
    %145 = arith.mulf %144, %142 : vector<1x64xf32>
    %146 = tpu.concatenate %142, %145 in 0 : vector<1x64xf32>, vector<1x64xf32> -> vector<2x64xf32>
    %147 = vector.extract_strided_slice %146 {offsets = [0, 0], sizes = [1, 64], strides = [1, 1]} : vector<2x64xf32> to vector<1x64xf32>
    %148 = vector.broadcast %147 : vector<1x64xf32> to vector<2x64xf32>
    %149 = arith.mulf %125, %148 : vector<2x64xf32>
    %150 = vector.extract_strided_slice %146 {offsets = [1, 0], sizes = [1, 64], strides = [1, 1]} : vector<2x64xf32> to vector<1x64xf32>
    %151 = vector.broadcast %150 : vector<1x64xf32> to vector<2x64xf32>
    %152 = arith.addf %149, %151 : vector<2x64xf32>
    %c0_56 = arith.constant 0 : index
    %c56 = arith.constant 56 : index
    %153 = vector.load %arg3[%c0_56, %c56] : memref<512x64xf32, #tpu.memory_space<vmem>>, vector<64x2xf32>
    %c4 = arith.constant 4 : index
    %c0_57 = arith.constant 0 : index
    %154 = vector.load %arg2[%c4, %c0_57] : memref<64x512xf32, #tpu.memory_space<vmem>>, vector<1x2xf32>
    %cst_58 = arith.constant dense<0.000000e+00> : vector<2x2xf32>
    %155 = tpu.matmul %152, %153, %cst_58 {dimension_numbers = #tpu.dot_dimension_numbers<[1], [0], [0], [1], [0, 0, 1, 1], [], []>} : vector<2x64xf32>, vector<64x2xf32>, vector<2x2xf32> -> vector<2x2xf32>
    %156 = vector.broadcast %154 : vector<1x2xf32> to vector<2x2xf32>
    %157 = arith.addf %155, %156 : vector<2x2xf32>
    %c0_59 = arith.constant 0 : index
    %c0_60 = arith.constant 0 : index
    %158 = vector.load %arg4[%c0_59, %c0_60] : memref<2x2xf32, #tpu.memory_space<vmem>>, vector<2x2xf32>
    tpu.vector_store %arg4[%c0_59, %c0_60], %157 {strides = array<i32>} : memref<2x2xf32, #tpu.memory_space<vmem>>, vector<2x2xf32>,
    return
  }
}

</mosaic_0001>

<bundles_post_ra>
// kernel: audio_classifier_forward.1
= control target key start
LH: loop header
LB: loop body
LE: loop exit
PB: predicated region body
PF: predicated region fallthrough
CT: control target
= control target key end

     0   :  { %9 = vsyncpa [#allocation3], 0  ;;  %s4216_s0 = inlined_call_operand.vmem [shape: f32[2,256], index: 0, kind: input, shape index: {}]   ;;  %s4217_s1 = inlined_call_operand.hbm [shape: bf16[512,768], index: 1, kind: input, shape index: {}]   ;;  %s4218_s2 = inlined_call_operand.vmem [shape: f32[64,512], index: 2, kind: input, shape index: {}]   ;;  %s4219_s3 = inlined_call_operand.vmem [shape: f32[512,64], index: 3, kind: input, shape index: {}]   ;;  %s4220_s4 = inlined_call_operand.hbm [shape: f32[2,2], index: 4, kind: output, shape index: {}]  }
   0x1   :  { %10 = vsyncpa [#allocation4], 0  ;;  %s3590_s15 = smov [#allocation2]   ;;  %s3542_s19 = scalar_lea.hbm %s4217_s1, 24576 }
   0x2   :  { %s18_s16 = sshll.u32 %s3590_s15, 4  ;;  %p3543_p0 = scmp.ne.s32.totalorder %s4217_s1, %s3542_s19  ;;  %s19_s16 = int_to_ptr.vmem [resolvable:$true] %s18_s16 }
   0x3   :  { %p3546_p1 = scmp.lt.u32.totalorder %s3542_s19, %s4217_s1 }
   0x5   :  { %p3548_p2 = pnand %p3546_p1, %p3543_p0 }
   0x7   :  { %3551 = shalt.err (!%p3548_p2)
}
   0x8   :  { %s3552_s24 = scalar_lea.vmem %s19_s16, 24576  ;;  %p3557_p4 = scmp.lt.s32.totalorder %s19_s16, %s19_s16 }
   0x9   :  { %p3553_p3 = scmp.ne.s32.totalorder %s19_s16, %s3552_s24  ;;  %p3558_p5 = scmp.lt.s32.totalorder %s3552_s24, %s3552_s24 }
   0xb   :  { %p3559_p6 = por %p3558_p5, %p3557_p4 }
   0xd   :  { %p3560_p7 = pnand %p3559_p6, %p3553_p3 }
   0xf   :  { %3563 = shalt.err (!%p3560_p7)
}
  0x10   :  { %s3591_s25 = smov 384   ;;  %s3592_s26 = smov 24  }
  0x11   :  { %24 = dma.hbm_to_vmem [thread:$0]  %s4217_s1, 24576, %s19_s16, [#allocation3], %s3591_s25, %s3591_s25, %s3592_s26  }
  0x12   :  { %3586 = dma.done.wait [#allocation3], 24576  }
  0x13   :  { %3587 = vsyncadd [#allocation3], 4294942720  ;;  %v3318_v0 = vld [vmem:[#allocation2 + $0x4] ss:$24 sps:$4 sm:$0xff]   ;;  %v3322_v2 = vld [vmem:[#allocation2] ss:$24 sps:$4 sm:$0xff]  }
  0x14   :  { %v3320_v1 = vld [vmem:[#allocation2 + $0xc] ss:$24 sps:$4 sm:$0xff]   ;;  %521 = vmatprep.subr.bf16.mxu0 %v3318_v0  ;;  %v3323_v3 = vld [vmem:[#allocation2 + $0x8] ss:$24 sps:$4 sm:$0xff]   ;;  %v3326_v5 = vld [vmem:[#allocation2 + $0x3c] ss:$24 sps:$4 sm:$0xff]  }
  0x15   :  { %562 = vmatprep.subr.bf16.mxu1 %v3320_v1  ;;  %v3324_v4 = vld [vmem:[#allocation2 + $0x34] ss:$24 sps:$4 sm:$0xff]   ;;  %522 = vmatpush1.bf16.msra.mxu0 %v3322_v2  ;;  %v3328_v6 = vld [vmem:[#allocation2 + $0x30] ss:$24 sps:$4 sm:$0xff]   ;;  %v3330_v8 = vld [vmem:[#allocation2 + $0x64] ss:$24 sps:$4 sm:$0xff]  }
  0x16   :  { %563 = vmatpush1.bf16.msra.mxu1 %v3323_v3  ;;  %523 = vmatprep.subr.bf16.mxu0 %v3324_v4  ;;  %v3329_v7 = vld [vmem:[#allocation2 + $0x38] ss:$24 sps:$4 sm:$0xff]   ;;  %v3332_v9 = vld [vmem:[#allocation2 + $0x6c] ss:$24 sps:$4 sm:$0xff]   ;;  %v3335_v11 = vld [vmem:[#allocation2 + $0x68] ss:$24 sps:$4 sm:$0xff]  }
  0x17   :  { %564 = vmatprep.subr.bf16.mxu1 %v3326_v5  ;;  %v3334_v10 = vld [vmem:[#allocation2 + $0x60] ss:$24 sps:$4 sm:$0xff]   ;;  %v3336_v12 = vld [vmem:[#allocation2 + $0x94] ss:$24 sps:$4 sm:$0xff]   ;;  %v3340_v14 = vld [vmem:[#allocation2 + $0x90] ss:$24 sps:$4 sm:$0xff]  }
  0x18   :  { %v3338_v13 = vld [vmem:[#allocation2 + $0x9c] ss:$24 sps:$4 sm:$0xff]   ;;  %v3341_v15 = vld [vmem:[#allocation2 + $0x98] ss:$24 sps:$4 sm:$0xff]   ;;  %v3344_v17 = vld [vmem:[#allocation2 + $0xcc] ss:$24 sps:$4 sm:$0xff]  }
  0x19   :  { %524 = vmatpush1.bf16.msra.mxu0 %v3328_v6  ;;  %v3342_v16 = vld [vmem:[#allocation2 + $0xc4] ss:$24 sps:$4 sm:$0xff]   ;;  %v3346_v18 = vld [vmem:[#allocation2 + $0xc0] ss:$24 sps:$4 sm:$0xff]   ;;  %v3348_v20 = vld [vmem:[#allocation2 + $0xf4] ss:$24 sps:$4 sm:$0xff]  }
  0x1a   :  { %565 = vmatpush1.bf16.msra.mxu1 %v3329_v7  ;;  %525 = vmatprep.subr.bf16.mxu0 %v3330_v8  ;;  %v3347_v19 = vld [vmem:[#allocation2 + $0xc8] ss:$24 sps:$4 sm:$0xff]   ;;  %v3350_v21 = vld [vmem:[#allocation2 + $0xfc] ss:$24 sps:$4 sm:$0xff]   ;;  %v3353_v23 = vld [vmem:[#allocation2 + $0xf8] ss:$24 sps:$4 sm:$0xff]  }
  0x1b   :  { %566 = vmatprep.subr.bf16.mxu1 %v3332_v9  ;;  %v3352_v22 = vld [vmem:[#allocation2 + $0xf0] ss:$24 sps:$4 sm:$0xff]   ;;  %v3354_v24 = vld [vmem:[#allocation2 + $0x124] ss:$24 sps:$4 sm:$0xff]   ;;  %v3358_v26 = vld [vmem:[#allocation2 + $0x120] ss:$24 sps:$4 sm:$0xff]  }
  0x1c   :  { %v3356_v25 = vld [vmem:[#allocation2 + $0x12c] ss:$24 sps:$4 sm:$0xff]   ;;  %v3359_v27 = vld [vmem:[#allocation2 + $0x128] ss:$24 sps:$4 sm:$0xff]   ;;  %v3362_v29 = vld [vmem:[#allocation2 + $0x15c] ss:$24 sps:$4 sm:$0xff]  }
  0x1d   :  { %526 = vmatpush1.bf16.msra.mxu0 %v3334_v10  ;;  %v3360_v28 = vld [vmem:[#allocation2 + $0x154] ss:$24 sps:$4 sm:$0xff]   ;;  %v3364_v30 = vld [vmem:[#allocation2 + $0x150] ss:$24 sps:$4 sm:$0xff]   ;;  %v3366_v32 = vld [vmem:[#allocation2 + $0x184] ss:$24 sps:$4 sm:$0xff]  }
  0x1e   :  { %567 = vmatpush1.bf16.msra.mxu1 %v3335_v11  ;;  %527 = vmatprep.subr.bf16.mxu0 %v3336_v12  ;;  %v3365_v31 = vld [vmem:[#allocation2 + $0x158] ss:$24 sps:$4 sm:$0xff]   ;;  %v3368_v33 = vld [vmem:[#allocation2 + $0x18c] ss:$24 sps:$4 sm:$0xff]   ;;  %v3371_v35 = vld [vmem:[#allocation2 + $0x188] ss:$24 sps:$4 sm:$0xff]  }
  0x1f   :  { %568 = vmatprep.subr.bf16.mxu1 %v3338_v13  ;;  %v3370_v34 = vld [vmem:[#allocation2 + $0x180] ss:$24 sps:$4 sm:$0xff]   ;;  %v3372_v36 = vld [vmem:[#allocation2 + $0x1b4] ss:$24 sps:$4 sm:$0xff]   ;;  %v3376_v38 = vld [vmem:[#allocation2 + $0x1b0] ss:$24 sps:$4 sm:$0xff]  }
  0x20   :  { %v3374_v37 = vld [vmem:[#allocation2 + $0x1bc] ss:$24 sps:$4 sm:$0xff]   ;;  %v3377_v39 = vld [vmem:[#allocation2 + $0x1b8] ss:$24 sps:$4 sm:$0xff]   ;;  %v3380_v41 = vld [vmem:[#allocation2 + $0x1ec] ss:$24 sps:$4 sm:$0xff]  }
  0x21   :  { %528 = vmatpush1.bf16.msra.mxu0 %v3340_v14  ;;  %v3378_v40 = vld [vmem:[#allocation2 + $0x1e4] ss:$24 sps:$4 sm:$0xff]   ;;  %v3382_v42 = vld [vmem:[#allocation2 + $0x1e0] ss:$24 sps:$4 sm:$0xff]   ;;  %v3384_v44 = vld [vmem:[#allocation2 + $0x214] ss:$24 sps:$4 sm:$0xff]  }
  0x22   :  { %569 = vmatpush1.bf16.msra.mxu1 %v3341_v15  ;;  %529 = vmatprep.subr.bf16.mxu0 %v3342_v16  ;;  %v3383_v43 = vld [vmem:[#allocation2 + $0x1e8] ss:$24 sps:$4 sm:$0xff]   ;;  %v3386_v45 = vld [vmem:[#allocation2 + $0x21c] ss:$24 sps:$4 sm:$0xff]   ;;  %v3389_v48 = vld [vmem:[#allocation2 + $0x218] ss:$24 sps:$4 sm:$0xff]  }
  0x23   :  { %570 = vmatprep.subr.bf16.mxu1 %v3344_v17  ;;  %v2609_v46 = vld.sshfl [vmem:[%s4216_s0] sm:$0x33 pattern:$0x76325410]  ;;  %v3388_v47 = vld [vmem:[#allocation2 + $0x210] ss:$24 sps:$4 sm:$0xff]  }
  0x24   :  { %v175_v49 = vcombine.high %v2609_v46, %v2609_v46  ;;  %v3390_v50 = vld [vmem:[#allocation2 + $0x244] ss:$24 sps:$4 sm:$0xff]   ;;  %v3394_v53 = vld [vmem:[#allocation2 + $0x240] ss:$24 sps:$4 sm:$0xff]   ;;  %v3396_v55 = vld [vmem:[#allocation2 + $0x274] ss:$24 sps:$4 sm:$0xff]   ;;  %v178_v17 = vpack.c.bf16 %v2609_v46, %v2609_v46 }
  0x25   :  { %530 = vmatpush1.bf16.msra.mxu0 %v3346_v18  ;;  %v3392_v51 = vld [vmem:[#allocation2 + $0x24c] ss:$24 sps:$4 sm:$0xff]   ;;  %v3395_v54 = vld [vmem:[#allocation2 + $0x248] ss:$24 sps:$4 sm:$0xff]   ;;  %v3398_v56 = vld [vmem:[#allocation2 + $0x27c] ss:$24 sps:$4 sm:$0xff]  }
  0x26   :  { %571 = vmatpush1.bf16.msra.mxu1 %v3347_v19  ;;  %531 = vmatprep.subr.bf16.mxu0 %v3348_v20  ;;  %v179_v52 = vpack.c.bf16 %v175_v49, %v175_v49  ;;  %v3400_v57 = vld [vmem:[#allocation2 + $0x270] ss:$24 sps:$4 sm:$0xff]   ;;  %v3402_v59 = vld [vmem:[#allocation2 + $0x2a4] ss:$24 sps:$4 sm:$0xff]   ;;  %v3406_v61 = vld [vmem:[#allocation2 + $0x2a0] ss:$24 sps:$4 sm:$0xff]  }
  0x27   :  { %572 = vmatprep.subr.bf16.mxu1 %v3350_v21  ;;  %v3401_v58 = vld [vmem:[#allocation2 + $0x278] ss:$24 sps:$4 sm:$0xff]   ;;  %v3404_v60 = vld [vmem:[#allocation2 + $0x2ac] ss:$24 sps:$4 sm:$0xff]   ;;  %v3407_v62 = vld [vmem:[#allocation2 + $0x2a8] ss:$24 sps:$4 sm:$0xff]  }
  0x28   :  { %553 = vmatprep.mubr.bf16.mxu0 %v179_v52  ;;  %594 = vmatprep.mubr.bf16.mxu1 %v179_v52  ;;  %v3408_v63 = vld [vmem:[#allocation2 + $0x2d4] ss:$24 sps:$4 sm:$0xff]   ;;  %v3643_v1 = vld [vmem:[%s4219_s3 + $0x80] sm:$0xff]  ;;  %v3412_v5 = vld [vmem:[#allocation2 + $0x2d0] ss:$24 sps:$4 sm:$0xff]   ;;  %vm607_vm0 = vcmask 1041408  }
  0x29   :  { %532 = vmatpush1.bf16.msra.mxu0 %v3352_v22  ;;  %v3410_v0 = vld [vmem:[#allocation2 + $0x2dc] ss:$24 sps:$4 sm:$0xff]   ;;  %v3648_v2 = vld [vmem:[%s4219_s3 + $0x88] sm:$0xff]  ;;  %v147_v3 = vld [vmem:[%s4219_s3 + $0x180] sm:$0xff]  ;;  %vm668_vm1 = vcmask 1040384   ;;  %vm831_vm2 = vcmask 64512  }
  0x2a   :  { %573 = vmatpush1.bf16.msra.mxu1 %v3353_v23  ;;  %533 = vmatprep.subr.bf16.mxu0 %v3354_v24  ;;  %v148_v4 = vld [vmem:[%s4219_s3 + $0x188] sm:$0xff]  ;;  %v3413_v6 = vld [vmem:[#allocation2 + $0x2d8] ss:$24 sps:$4 sm:$0xff]   ;;  %v3659_v7 = vld [vmem:[%s4219_s3] sm:$0xff]  ;;  %v3020_v15 = vpack.c.bf16 %v3648_v2, %v3643_v1  ;;  %s3594_s1 = smov 120   ;;  %vm1786_vm3 = vcmask 130048  }
  0x2b   :  { %574 = vmatprep.subr.bf16.mxu1 %v3356_v25  ;;  %v3664_v8 = vld [vmem:[%s4219_s3 + $0x8] sm:$0xff]  ;;  %v131_v9 = vld [vmem:[%s4219_s3 + $0x100] sm:$0xff]  ;;  %v3675_v11 = vld [vmem:[%s4219_s3 + $0x90] sm:$0xff]  ;;  %v3052_v16 = vpack.c.bf16 %v148_v4, %v147_v3  ;;  %s3596_s28 = smov 104   ;;  %vm3597_vm4 = vmmov 0   ;;  %vm2241_vm5 = vcmask 261120  }
  0x2c   :  { %v132_v10 = vld [vmem:[%s4219_s3 + $0x108] sm:$0xff]  ;;  %v3680_v12 = vld [vmem:[%s4219_s3 + $0x98] sm:$0xff]  ;;  %v149_v13 = vld [vmem:[%s4219_s3 + $0x190] sm:$0xff]  ;;  %v3022_v22 = vpack.c.bf16 %v3664_v8, %v3659_v7  ;;  %s3598_s26 = smov 72   ;;  %vm2432_vm6 = vcmask 517120   ;;  %vm2518_vm7 = vcmask 523264  }
  0x2d   :  { %534 = vmatpush1.bf16.msra.mxu0 %v3358_v26  ;;  %v150_v14 = vld [vmem:[%s4219_s3 + $0x198] sm:$0xff]  ;;  %v3693_v18 = vld [vmem:[%s4219_s3 + $0x10] sm:$0xff]  ;;  %v3054_v23 = vpack.c.bf16 %v132_v10, %v131_v9  ;;  %v3711_v24 = vld [vmem:[%s4219_s3 + $0xa0] sm:$0xff]  ;;  %s3599_s0 = smov [#allocation5]   ;;  %vm2592_vm8 = vcmask 9216  }
  0x2e   :  { %575 = vmatpush1.bf16.msra.mxu1 %v3359_v27  ;;  %535 = vmatprep.subr.bf16.mxu0 %v3360_v28  ;;  %v3698_v19 = vld [vmem:[%s4219_s3 + $0x18] sm:$0xff]  ;;  %v133_v20 = vld [vmem:[%s4219_s3 + $0x110] sm:$0xff]  ;;  %v3716_v25 = vld [vmem:[%s4219_s3 + $0xa8] sm:$0xff]  ;;  %v3024_v28 = vpack.c.bf16 %v3680_v12, %v3675_v11  ;;  %s2600_s30 = sshll.u32 %s3599_s0, 4  ;;  %s2601_s30 = int_to_ptr.vmem [resolvable:$true] %s2600_s30 }
  0x2f   :  { %576 = vmatprep.subr.bf16.mxu1 %v3362_v29  ;;  %v134_v21 = vld [vmem:[%s4219_s3 + $0x118] sm:$0xff]  ;;  %v151_v26 = vld [vmem:[%s4219_s3 + $0x1a0] sm:$0xff]  ;;  %v152_v27 = vld [vmem:[%s4219_s3 + $0x1a8] sm:$0xff]  ;;  %v3056_v29 = vpack.c.bf16 %v150_v14, %v149_v13  ;;  %s3564_s5 = scalar_lea.vmem %s2601_s30, 32  ;;  %p3569_p9 = scmp.lt.s32.totalorder %s2601_s30, %s2601_s30 }
  0x30   :  { %v3774_v46 = vld [vmem:[%s4219_s3 + $0x38] sm:$0xff]  ;;  %v137_v49 = vld [vmem:[%s4219_s3 + $0x130] sm:$0xff]  ;;  %v3787_v52 = vld [vmem:[%s4219_s3 + $0xc0] sm:$0xff]  ;;  %p3565_p8 = scmp.ne.s32.totalorder %s2601_s30, %s3564_s5  ;;  %p3570_p10 = scmp.lt.s32.totalorder %s3564_s5, %s3564_s5 }
  0x31   :  { %536 = vmatpush1.bf16.msra.mxu0 %v3364_v30  ;;  %v3026_v30 = vpack.c.bf16 %v3698_v19, %v3693_v18  ;;  %v3828_v3 = vld [vmem:[%s4219_s3 + $0xd8] sm:$0xff]  ;;  %v157_v4 = vld [vmem:[%s4219_s3 + $0x1d0] sm:$0xff] }
  0x32   :  { %577 = vmatpush1.bf16.msra.mxu1 %v3365_v31  ;;  %537 = vmatprep.subr.bf16.mxu0 %v3366_v32  ;;  %v3058_v31 = vpack.c.bf16 %v134_v21, %v133_v20  ;;  %v3028_v32 = vpack.c.bf16 %v3716_v25, %v3711_v24  ;;  %v3841_v9 = vld [vmem:[%s4219_s3 + $0x50] sm:$0xff]  ;;  %v3846_v10 = vld [vmem:[%s4219_s3 + $0x58] sm:$0xff]  ;;  %v3859_v20 = vld [vmem:[%s4219_s3 + $0xe0] sm:$0xff]  ;;  %p3571_p11 = por %p3570_p10, %p3569_p9 }
  0x33   :  { %578 = vmatprep.subr.bf16.mxu1 %v3368_v33  ;;  %v3060_v33 = vpack.c.bf16 %v152_v27, %v151_v26  ;;  %v3042_v14 = vpack.c.bf16 %v3846_v10, %v3841_v9  ;;  %v3864_v21 = vld [vmem:[%s4219_s3 + $0xe8] sm:$0xff]  ;;  %v3877_v27 = vld [vmem:[%s4219_s3 + $0x60] sm:$0xff] }
  0x34   :  { %v160_v26 = vld [vmem:[%s4219_s3 + $0x1e8] sm:$0xff]  ;;  %p3572_p12 = pnand %p3571_p11, %p3565_p8 }
  0x35   :  { %538 = vmatpush1.bf16.msra.mxu0 %v3370_v34  ;;  %v3733_v34 = vld [vmem:[%s4219_s3 + $0x20] sm:$0xff] }
  0x36   :  { %579 = vmatpush1.bf16.msra.mxu1 %v3371_v35  ;;  %539 = vmatprep.subr.bf16.mxu0 %v3372_v36  ;;  %v3738_v35 = vld [vmem:[%s4219_s3 + $0x28] sm:$0xff]  ;;  %v135_v36 = vld [vmem:[%s4219_s3 + $0x120] sm:$0xff] }
  0x37   :  { %580 = vmatprep.subr.bf16.mxu1 %v3374_v37  ;;  %v3030_v37 = vpack.c.bf16 %v3738_v35, %v3733_v34 }
  0x39   :  { %540 = vmatpush1.bf16.msra.mxu0 %v3376_v38  ;;  %v136_v38 = vld [vmem:[%s4219_s3 + $0x128] sm:$0xff] }
  0x3a   :  { %581 = vmatpush1.bf16.msra.mxu1 %v3377_v39  ;;  %541 = vmatprep.subr.bf16.mxu0 %v3378_v40  ;;  %v3062_v39 = vpack.c.bf16 %v136_v38, %v135_v36  ;;  %v3751_v40 = vld [vmem:[%s4219_s3 + $0xb0] sm:$0xff] }
  0x3b   :  { %582 = vmatprep.subr.bf16.mxu1 %v3380_v41  ;;  %v3756_v41 = vld [vmem:[%s4219_s3 + $0xb8] sm:$0xff]  ;;  %v161_v38 = vld [vmem:[%s4219_s3 + $0x1f0] sm:$0xff] }
  0x3d   :  { %542 = vmatpush1.bf16.msra.mxu0 %v3382_v42  ;;  %v153_v42 = vld [vmem:[%s4219_s3 + $0x1b0] sm:$0xff] }
  0x3e   :  { %583 = vmatpush1.bf16.msra.mxu1 %v3383_v43  ;;  %543 = vmatprep.subr.bf16.mxu0 %v3384_v44  ;;  %v3032_v43 = vpack.c.bf16 %v3756_v41, %v3751_v40  ;;  %v154_v44 = vld [vmem:[%s4219_s3 + $0x1b8] sm:$0xff] }
  0x3f   :  { %584 = vmatprep.subr.bf16.mxu1 %v3386_v45  ;;  %v3769_v45 = vld [vmem:[%s4219_s3 + $0x30] sm:$0xff] }
  0x41   :  { %544 = vmatpush1.bf16.msra.mxu0 %v3388_v47  ;;  %v3064_v47 = vpack.c.bf16 %v154_v44, %v153_v42  ;;  %v3913_v44 = vld [vmem:[%s4219_s3 + $0x70] sm:$0xff] }
  0x42   :  { %585 = vmatpush1.bf16.msra.mxu1 %v3389_v48  ;;  %545 = vmatprep.subr.bf16.mxu0 %v3390_v50  ;;  %v3034_v48 = vpack.c.bf16 %v3774_v46, %v3769_v45  ;;  %v138_v50 = vld [vmem:[%s4219_s3 + $0x138] sm:$0xff]  ;;  %4231 = vst [vmem:[#allocation8_spill] sm:$0xff] %v3913_v44 }
  0x43   :  { %586 = vmatprep.subr.bf16.mxu1 %v3392_v51  ;;  %v3066_v51 = vpack.c.bf16 %v138_v50, %v137_v49  ;;  %v146_v50 = vld [vmem:[%s4219_s3 + $0x178] sm:$0xff] }
  0x45   :  { %546 = vmatpush1.bf16.msra.mxu0 %v3394_v53  ;;  %v3792_v53 = vld [vmem:[%s4219_s3 + $0xc8] sm:$0xff] }
  0x46   :  { %587 = vmatpush1.bf16.msra.mxu1 %v3395_v54  ;;  %547 = vmatprep.subr.bf16.mxu0 %v3396_v55  ;;  %v155_v54 = vld [vmem:[%s4219_s3 + $0x1c0] sm:$0xff]  ;;  %v3036_v55 = vpack.c.bf16 %v3792_v53, %v3787_v52 }
  0x47   :  { %588 = vmatprep.subr.bf16.mxu1 %v3398_v56  ;;  %v156_v56 = vld [vmem:[%s4219_s3 + $0x1c8] sm:$0xff] }
  0x49   :  { %548 = vmatpush1.bf16.msra.mxu0 %v3400_v57  ;;  %v3805_v57 = vld [vmem:[%s4219_s3 + $0x40] sm:$0xff] }
  0x4a   :  { %589 = vmatpush1.bf16.msra.mxu1 %v3401_v58  ;;  %549 = vmatprep.subr.bf16.mxu0 %v3402_v59  ;;  %v3810_v58 = vld [vmem:[%s4219_s3 + $0x48] sm:$0xff]  ;;  %v3068_v59 = vpack.c.bf16 %v156_v56, %v155_v54  ;;  %v181_v54 = vlaneseq }
  0x4b   :  { %590 = vmatprep.subr.bf16.mxu1 %v3404_v60  ;;  %v3038_v60 = vpack.c.bf16 %v3810_v58, %v3805_v57 }
  0x4d   :  { %550 = vmatpush1.bf16.msra.mxu0 %v3406_v61  ;;  %v139_v61 = vld [vmem:[%s4219_s3 + $0x140] sm:$0xff] }
  0x4e   :  { %591 = vmatpush1.bf16.msra.mxu1 %v3407_v62  ;;  %551 = vmatprep.subr.bf16.mxu0 %v3408_v63  ;;  %v140_v62 = vld [vmem:[%s4219_s3 + $0x148] sm:$0xff] }
  0x4f   :  { %592 = vmatprep.subr.bf16.mxu1 %v3410_v0  ;;  %v3070_v63 = vpack.c.bf16 %v140_v62, %v139_v61  ;;  %v3823_v0 = vld [vmem:[%s4219_s3 + $0xd0] sm:$0xff] }
  0x51   :  { %552 = vmatpush1.bf16.msra.mxu0 %v3412_v5  ;;  %v3040_v5 = vpack.c.bf16 %v3828_v3, %v3823_v0 }
  0x52   :  { %593 = vmatpush1.bf16.msra.mxu1 %v3413_v6  ;;  %3021 = vmatprep.subr.bf16.mxu0 %v3020_v15  ;;  %v158_v6 = vld [vmem:[%s4219_s3 + $0x1d8] sm:$0xff]  ;;  %v141_v15 = vld [vmem:[%s4219_s3 + $0x150] sm:$0xff] }
  0x53   :  { %3053 = vmatprep.subr.bf16.mxu1 %v3052_v16  ;;  %v3072_v13 = vpack.c.bf16 %v158_v6, %v157_v4  ;;  %v142_v16 = vld [vmem:[%s4219_s3 + $0x158] sm:$0xff] }
  0x54   :  { %554 = vmatmul.mubr.bf16.vlgmr.msra.gmra.mrb[0].mxu0 %v178_v17 }
  0x55   :  { %595 = vmatmul.mubr.bf16.vlgmr.msra.gmra.mrb[0].mxu1 %v178_v17  ;;  %3023 = vmatpush3.bf16.msra.mxu0 %v3022_v22  ;;  %v3074_v17 = vpack.c.bf16 %v142_v16, %v141_v15  ;;  %v159_v22 = vld [vmem:[%s4219_s3 + $0x1e0] sm:$0xff] }
  0x56   :  { %3055 = vmatpush3.bf16.msra.mxu1 %v3054_v23  ;;  %3025 = vmatprep.subr.bf16.mxu0 %v3024_v28  ;;  %v3044_v23 = vpack.c.bf16 %v3864_v21, %v3859_v20  ;;  %v3882_v28 = vld [vmem:[%s4219_s3 + $0x68] sm:$0xff] }
  0x57   :  { %3057 = vmatprep.subr.bf16.mxu1 %v3056_v29  ;;  %v3076_v29 = vpack.c.bf16 %v160_v26, %v159_v22 }
  0x59   :  { %3027 = vmatpush3.bf16.msra.mxu0 %v3026_v30  ;;  %v3046_v30 = vpack.c.bf16 %v3882_v28, %v3877_v27 }
  0x5a   :  { %3059 = vmatpush3.bf16.msra.mxu1 %v3058_v31  ;;  %3029 = vmatprep.subr.bf16.mxu0 %v3028_v32  ;;  %v143_v31 = vld [vmem:[%s4219_s3 + $0x160] sm:$0xff]  ;;  %v144_v32 = vld [vmem:[%s4219_s3 + $0x168] sm:$0xff] }
  0x5b   :  { %3061 = vmatprep.subr.bf16.mxu1 %v3060_v33  ;;  %v3895_v33 = vld [vmem:[%s4219_s3 + $0xf0] sm:$0xff]  ;;  %v3078_v36 = vpack.c.bf16 %v144_v32, %v143_v31 }
  0x5d   :  { %3031 = vmatpush3.bf16.msra.mxu0 %v3030_v37  ;;  %v3900_v37 = vld [vmem:[%s4219_s3 + $0xf8] sm:$0xff] }
  0x5e   :  { %3063 = vmatpush3.bf16.msra.mxu1 %v3062_v39  ;;  %3033 = vmatprep.subr.bf16.mxu0 %v3032_v43  ;;  %v162_v39 = vld [vmem:[%s4219_s3 + $0x1f8] sm:$0xff]  ;;  %v3048_v42 = vpack.c.bf16 %v3900_v37, %v3895_v33 }
  0x5f   :  { %3065 = vmatprep.subr.bf16.mxu1 %v3064_v47  ;;  %v3080_v43 = vpack.c.bf16 %v162_v39, %v161_v38  ;;  %v3918_v47 = vld [vmem:[%s4219_s3 + $0x78] sm:$0xff] }
  0x60   :  { %4232 = vst [vmem:[#allocation9_spill] sm:$0xff] %v3918_v47  ;;  %v3050_v49 = vpack.c.bf16 %v3918_v47, %v3913_v44 }
  0x61   :  { %3035 = vmatpush3.bf16.msra.mxu0 %v3034_v48  ;;  %v145_v48 = vld [vmem:[%s4219_s3 + $0x170] sm:$0xff] }
  0x62   :  { %3067 = vmatpush3.bf16.msra.mxu1 %v3066_v51  ;;  %3037 = vmatprep.subr.bf16.mxu0 %v3036_v55  ;;  %v3082_v51 = vpack.c.bf16 %v146_v50, %v145_v48  ;;  %v182_v55 = vshrl.u32 %v181_v54, 7 }
  0x63   :  { %3069 = vmatprep.subr.bf16.mxu1 %v3068_v59 }
  0x64   :  { %v3928_v56 = vsub.s32 0, %v182_v55  ;;  %v191_v59 = vsub.s32 2, %v182_v55  ;;  %v3933_v61 = vsub.s32 1, %v182_v55  ;;  %v195_v62 = vsub.s32 3, %v182_v55 }
  0x65   :  { %3039 = vmatpush3.bf16.msra.mxu0 %v3038_v60  ;;  %v98_v60 = vld [vmem:[%s4218_s2] ss:$8 sm:$0xf] }
  0x66   :  { %3071 = vmatpush3.bf16.msra.mxu1 %v3070_v63  ;;  %3041 = vmatprep.subr.bf16.mxu0 %v3040_v5  ;;  %4233 = vst [vmem:[#allocation10_spill] sm:$0xff] %v3928_v56  ;;  %4234 = vst [vmem:[#allocation11_spill] sm:$0xff] %v3933_v61  ;;  %v184_v63 = vrot.slane %v98_v60, %v3928_v56  ;;  %v192_v4 = vrot.slane %v98_v60, %v191_v59 }
  0x67   :  { %3073 = vmatprep.subr.bf16.mxu1 %v3072_v13  ;;  %v188_v5 = vrot.slane %v98_v60, %v3933_v61  ;;  %v196_v6 = vrot.slane %v98_v60, %v195_v62 }
  0x69   :  { %3043 = vmatpush3.bf16.msra.mxu0 %v3042_v14 }
  0x6a   :  { %3075 = vmatpush3.bf16.msra.mxu1 %v3074_v17  ;;  %3045 = vmatprep.subr.bf16.mxu0 %v3044_v23 }
  0x6b   :  { %3077 = vmatprep.subr.bf16.mxu1 %v3076_v29 }
  0x6d   :  { %3047 = vmatpush3.bf16.msra.mxu0 %v3046_v30 }
  0x6e   :  { %3079 = vmatpush3.bf16.msra.mxu1 %v3078_v36  ;;  %3049 = vmatprep.subr.bf16.mxu0 %v3048_v42 }
  0x6f   :  { %3081 = vmatprep.subr.bf16.mxu1 %v3080_v43 }
  0x71   :  { %3051 = vmatpush3.bf16.msra.mxu0 %v3050_v49 }
  0x72   :  { %3083 = vmatpush3.bf16.msra.mxu1 %v3082_v51 }
 0x127   :  { %v555_v13 = vpop.f32.mrb[0].mxu0 }
 0x128   :  { %v596_v14 = vpop.f32.mrb[0].mxu1  ;;  %v556_v15 = vadd.f32 %v555_v13, %v184_v63  ;;  %v557_v17 = vpop.f32.mrb[1].mxu0 }
 0x129   :  { %v597_v16 = vadd.f32 %v596_v14, %v192_v4  ;;  %v598_v22 = vpop.f32.mrb[1].mxu1  ;;  %v558_v23 = vadd.f32 %v557_v17, %v188_v5  ;;  %v559_v29 = vpop.f32.mrb[2].mxu0 }
 0x12a   :  { %v599_v26 = vadd.f32 %v598_v22, %v196_v6  ;;  %v600_v30 = vpop.f32.mrb[2].mxu1  ;;  %v3937_v31 = vmax.f32 %v556_v15, 0.0  ;;  %v560_v36 = vpop.f32.mrb[3].mxu0 }
 0x12b   :  { %v3939_v32 = vmax.f32 %v597_v16, 0.0  ;;  %v601_v38 = vpop.f32.mrb[3].mxu1  ;;  %v3941_v39 = vmax.f32 %v558_v23, 0.0 }
 0x12c   :  { %4235 = vst [vmem:[#allocation12_spill] sm:$0xff] %v3937_v31  ;;  %v3943_v42 = vmax.f32 %v599_v26, 0.0  ;;  %v608_v43 = vsel %vm607_vm0, %v3937_v31, 0.0  ;;  %v636_v48 = vmul.f32 %v3937_v31, %v3937_v31 }
 0x12d   :  { %4236 = vst [vmem:[#allocation13_spill] sm:$0xff] %v3939_v32  ;;  %4237 = vst [vmem:[#allocation14_spill] sm:$0xff] %v3941_v39  ;;  %v622_v49 = vsel %vm607_vm0, %v3939_v32, 0.0  ;;  %v638_v50 = vmul.f32 %v3939_v32, %v3939_v32  ;;  %v609_v51 = vrot.slane %v608_v43, 4  ;;  %v615_v55 = vsel %vm607_vm0, %v3941_v39, 0.0 }
 0x12e   :  { %4238 = vst [vmem:[#allocation15_spill] sm:$0xff] %v3943_v42  ;;  %v623_v54 = vrot.slane %v622_v49, 4  ;;  %v637_v59 = vmul.f32 %v3941_v39, %v3941_v39  ;;  %v640_v60 = vsel %vm607_vm0, %v636_v48, 0.0  ;;  %v616_v63 = vrot.slane %v615_v55, 4 }
 0x12f   :  { %v654_v62 = vsel %vm607_vm0, %v638_v50, 0.0  ;;  %v629_v4 = vsel %vm607_vm0, %v3943_v42, 0.0  ;;  %v610_v5 = vadd.f32 %v609_v51, %v608_v43  ;;  %v641_v6 = vrot.slane %v640_v60, 4 }
 0x130   :  { %v624_v13 = vadd.f32 %v623_v54, %v622_v49  ;;  %v655_v14 = vrot.slane %v654_v62, 4  ;;  %v617_v15 = vadd.f32 %v616_v63, %v615_v55  ;;  %v647_v16 = vsel %vm607_vm0, %v637_v59, 0.0 }
 0x131   :  { %v630_v17 = vrot.slane %v629_v4, 4  ;;  %v639_v22 = vmul.f32 %v3943_v42, %v3943_v42  ;;  %v611_v23 = vrot.slane %v610_v5, 2  ;;  %v642_v26 = vadd.f32 %v641_v6, %v640_v60 }
 0x132   :  { %v656_v29 = vadd.f32 %v655_v14, %v654_v62  ;;  %v618_v30 = vrot.slane %v617_v15, 2  ;;  %v648_v36 = vrot.slane %v647_v16, 4  ;;  %v625_v43 = vrot.slane %v624_v13, 2 }
 0x133   :  { %v631_v38 = vadd.f32 %v630_v17, %v629_v4  ;;  %v661_v48 = vsel %vm607_vm0, %v639_v22, 0.0  ;;  %v643_v50 = vrot.slane %v642_v26, 2  ;;  %v612_v59 = vadd.f32 %v611_v23, %v610_v5 }
 0x134   :  { %v657_v51 = vrot.slane %v656_v29, 2  ;;  %v649_v49 = vadd.f32 %v648_v36, %v647_v16  ;;  %v662_v55 = vrot.slane %v661_v48, 4  ;;  %v619_v63 = vadd.f32 %v618_v30, %v617_v15 }
 0x135   :  { %v632_v54 = vrot.slane %v631_v38, 2  ;;  %v644_v32 = vadd.f32 %v643_v50, %v642_v26  ;;  %v626_v60 = vadd.f32 %v625_v43, %v624_v13  ;;  %v613_v17 = vrot.slane %v612_v59, 1 }
 0x136   :  { %v658_v39 = vadd.f32 %v657_v51, %v656_v29  ;;  %v663_v61 = vadd.f32 %v662_v55, %v661_v48  ;;  %v650_v42 = vrot.slane %v649_v49, 2  ;;  %v620_v6 = vrot.slane %v619_v63, 1 }
 0x137   :  { %v633_v31 = vadd.f32 %v632_v54, %v631_v38  ;;  %v645_v62 = vrot.slane %v644_v32, 1  ;;  %v627_v36 = vrot.slane %v626_v60, 1  ;;  %v614_v26 = vadd.f32 %v613_v17, %v612_v59 }
 0x138   :  { %v651_v14 = vadd.f32 %v650_v42, %v649_v49  ;;  %v664_v4 = vrot.slane %v663_v61, 2  ;;  %v659_v22 = vrot.slane %v658_v39, 1  ;;  %v621_v15 = vadd.f32 %v620_v6, %v619_v63 }
 0x139   :  { %v634_v47 = vrot.slane %v633_v31, 1  ;;  %v646_v16 = vadd.f32 %v645_v62, %v644_v32  ;;  %v628_v48 = vadd.f32 %v627_v36, %v626_v60  ;;  %v3593_v32 = vmov 0.0  }
 0x13a   :  { %v652_v56 = vrot.slane %v651_v14, 1  ;;  %v665_v44 = vadd.f32 %v664_v4, %v663_v61  ;;  %v660_v29 = vadd.f32 %v659_v22, %v658_v39  ;;  %v3416_v39 = vld [vmem:[#allocation2 + $0x14] ss:$24 sps:$4 sm:$0xff]  }
 0x13b   :  { %v635_v13 = vadd.f32 %v634_v47, %v633_v31  ;;  %v669_v42 = vsel %vm668_vm1, %v614_v26, %v646_v16  ;;  %v163_v47 = vld [vmem:[%s4218_s2 + $0x20] sm:$0xff]  ;;  %v165_v31 = vld [vmem:[%s4218_s2 + $0x30] sm:$0xff] }
 0x13c   :  { %v653_v5 = vadd.f32 %v652_v56, %v651_v14  ;;  %v666_v23 = vrot.slane %v665_v44, 1  ;;  %v671_v61 = vsel %vm668_vm1, %v628_v48, %v660_v29  ;;  %v164_v56 = vld [vmem:[%s4218_s2 + $0x28] sm:$0xff]  ;;  %v3419_v26 = vld [vmem:[#allocation2 + $0x44] ss:$24 sps:$4 sm:$0xff]   ;;  %v3423_v48 = vld [vmem:[#allocation2 + $0xa0] ss:$24 sps:$4 sm:$0xff]  }
 0x13d   :  { %835 = vmatprep.subr.mxu0 %v164_v56  ;;  %v3431_v56 = vld [vmem:[#allocation2 + $0x104] ss:$24 sps:$4 sm:$0xff]  }
 0x13e   :  { %v670_v30 = vsel %vm668_vm1, %v621_v15, %v653_v5  ;;  %v667_v38 = vadd.f32 %v666_v23, %v665_v44  ;;  %v166_v44 = vld [vmem:[%s4218_s2 + $0x38] sm:$0xff]  ;;  %v3414_v23 = vld [vmem:[#allocation2 + $0x10] ss:$24 sps:$4 sm:$0xff]  }
 0x13f   :  { %737 = vmatprep.mubr.f32.mxu0 %v670_v30  ;;  %906 = vmatprep.subr.mxu1 %v166_v44  ;;  %v3417_v30 = vld [vmem:[#allocation2 + $0x40] ss:$24 sps:$4 sm:$0xff]   ;;  %v3434_v44 = vld [vmem:[#allocation2 + $0x134] ss:$24 sps:$4 sm:$0xff]  }
 0x140   :  { %v672_v50 = vsel %vm668_vm1, %v635_v13, %v667_v38  ;;  %738 = vmatmul.mubr.f32.vlgmr.msra.gmra.mrb[4].mxu0 %v669_v42  ;;  %v3422_v13 = vld [vmem:[#allocation2 + $0x74] ss:$24 sps:$4 sm:$0xff]   ;;  %v3420_v38 = vld [vmem:[#allocation2 + $0x70] ss:$24 sps:$4 sm:$0xff]   ;;  %v3425_v42 = vld [vmem:[#allocation2 + $0xa4] ss:$24 sps:$4 sm:$0xff]  }
 0x141   :  { %807 = vmatprep.mubr.f32.mxu1 %v672_v50  ;;  %836 = vmatpush1.msra.mxu0 %v163_v47  ;;  %v3428_v50 = vld [vmem:[#allocation2 + $0xd4] ss:$24 sps:$4 sm:$0xff]   ;;  %v3429_v47 = vld [vmem:[#allocation2 + $0x100] ss:$24 sps:$4 sm:$0xff]  }
 0x142   :  { %808 = vmatmul.mubr.f32.vlgmr.msra.gmra.mrb[4].mxu1 %v671_v61  ;;  %899 = vmatprep.mubr.f32.mxu0 %v3593_v32  ;;  %v3426_v61 = vld [vmem:[#allocation2 + $0xd0] ss:$24 sps:$4 sm:$0xff]  }
 0x143   :  { %907 = vmatpush1.msra.mxu1 %v165_v31  ;;  %970 = vmatprep.mubr.f32.mxu1 %v3593_v32  ;;  %v3432_v31 = vld [vmem:[#allocation2 + $0x130] ss:$24 sps:$4 sm:$0xff]  }
 0x144   :  { %1454 = vmatprep.subr.bf16.mxu0 %v3416_v39  ;;  %v3437_v39 = vld [vmem:[#allocation2 + $0x164] ss:$24 sps:$4 sm:$0xff]  }
 0x213   :  { %v2800_v43 = vpop.f32.mrb[4].mxu0 }
 0x214   :  { %v2801_v51 = vpop.f32.mrb[5].mxu0 }
 0x215   :  { %v2835_v49 = vpop.f32.mrb[4].mxu1  ;;  %v2802_v54 = vadd.f32 %v2801_v51, %v2800_v43  ;;  %v3435_v43 = vld [vmem:[#allocation2 + $0x160] ss:$24 sps:$4 sm:$0xff]   ;;  %v3440_v51 = vld [vmem:[#allocation2 + $0x194] ss:$24 sps:$4 sm:$0xff]  }
 0x216   :  { %v2836_v55 = vpop.f32.mrb[5].mxu1 }
 0x217   :  { %v2837_v63 = vadd.f32 %v2836_v55, %v2835_v49  ;;  %v3438_v49 = vld [vmem:[#allocation2 + $0x190] ss:$24 sps:$4 sm:$0xff]   ;;  %v3441_v55 = vld [vmem:[#allocation2 + $0x1c0] ss:$24 sps:$4 sm:$0xff]  }
 0x219   :  { %v810_v59 = vadd.f32 %v2837_v63, %v2802_v54  ;;  %v3443_v54 = vld [vmem:[#allocation2 + $0x1c4] ss:$24 sps:$4 sm:$0xff]   ;;  %v3446_v63 = vld [vmem:[#allocation2 + $0x1f4] ss:$24 sps:$4 sm:$0xff]  }
 0x21b   :  { %v813_v60 = vmul.f32 0.0078125, %v810_v59  ;;  %v3444_v59 = vld [vmem:[#allocation2 + $0x1f0] ss:$24 sps:$4 sm:$0xff]  }
 0x21d   :  { %v814_v62 = vmul.f32 %v813_v60, %v813_v60  ;;  %v822_v16 = vsub.f32 0.0, %v813_v60 }
 0x21f   :  { %v816_v6 = vrot.slane %v814_v62, 7  ;;  %v3447_v62 = vld [vmem:[#allocation2 + $0x220] ss:$24 sps:$4 sm:$0xff]  }
 0x221   :  { %v818_v14 = vsub.f32 %v813_v60, %v816_v6  ;;  %v3449_v60 = vld [vmem:[#allocation2 + $0x224] ss:$24 sps:$4 sm:$0xff]   ;;  %v3452_v6 = vld [vmem:[#allocation2 + $0x254] ss:$24 sps:$4 sm:$0xff]  }
 0x223   :  { %v819_v4 = vmax.f32 %v818_v14, 0.0  ;;  %v3450_v14 = vld [vmem:[#allocation2 + $0x250] ss:$24 sps:$4 sm:$0xff]  }
 0x225   :  { %v820_v17 = vadd.f32 1e-05, %v819_v4  ;;  %v3455_v4 = vld [vmem:[#allocation2 + $0x284] ss:$24 sps:$4 sm:$0xff]  }
 0x227   :  { %3534 = vrsqrt.f32 %v820_v17  ;;  %v3453_v17 = vld [vmem:[#allocation2 + $0x280] ss:$24 sps:$4 sm:$0xff]  }
 0x231   :  { %v3535_v22 = vpop.eup %3534 }
 0x232   :  { %v824_v36 = vrot.slane %v3535_v22, 1  ;;  %v3458_v22 = vld [vmem:[#allocation2 + $0x2b4] ss:$24 sps:$4 sm:$0xff]  }
 0x234   :  { %v826_v15 = vmul.f32 %v824_v36, %v822_v16  ;;  %v3456_v16 = vld [vmem:[#allocation2 + $0x2b0] ss:$24 sps:$4 sm:$0xff]  }
 0x236   :  { %v828_v5 = vrot.slane %v826_v15, 7  ;;  %v3459_v15 = vld [vmem:[#allocation2 + $0x2e0] ss:$24 sps:$4 sm:$0xff]  }
 0x238   :  { %v830_v29 = vsel %vm668_vm1, %v824_v36, %v828_v5  ;;  %v3461_v36 = vld [vmem:[#allocation2 + $0x2e4] ss:$24 sps:$4 sm:$0xff]   ;;  %v3464_v5 = vld [vmem:[#allocation2 + $0x314] ss:$24 sps:$4 sm:$0xff]  }
 0x239   :  { %2674 = vmatmul.mubr.msk.f32.vlgmr.msra.gmra.mrb[6].mxu0 %vm831_vm2, %v830_v29  ;;  %2675 = vmatmul.mubr.msk.f32.vlgmr.msra.gmra.mrb[6].mxu1 %vm831_vm2, %v830_v29  ;;  %v3183_v29 = vpack.i.bf16 %v3664_v8, %v3659_v7  ;;  %v3213_v7 = vpack.i.bf16 %v3774_v46, %v3769_v45  ;;  %v3218_v8 = vpack.i.bf16 %v3792_v53, %v3787_v52  ;;  %v4241_v46 = vld [vmem:[#allocation10_spill] sm:$0xff] }
 0x23a   :  { %1455 = vmatpush1.bf16.msra.mxu0 %v3414_v23  ;;  %v3178_v23 = vpack.i.bf16 %v3648_v2, %v3643_v1  ;;  %v3203_v1 = vpack.i.bf16 %v3738_v35, %v3733_v34  ;;  %v3208_v2 = vpack.i.bf16 %v3756_v41, %v3751_v40  ;;  %v4239_v34 = vld [vmem:[#allocation8_spill] sm:$0xff]  ;;  %v4240_v35 = vld [vmem:[#allocation9_spill] sm:$0xff] }
 0x23b   :  { %1456 = vmatprep.subr.bf16.mxu0 %v3419_v26  ;;  %v3188_v26 = vpack.i.bf16 %v3680_v12, %v3675_v11  ;;  %v3223_v11 = vpack.i.bf16 %v3810_v58, %v3805_v57  ;;  %v3228_v12 = vpack.i.bf16 %v3828_v3, %v3823_v0  ;;  %v3253_v40 = vpack.i.bf16 %v4240_v35, %v4239_v34  ;;  %v4242_v3 = vld [vmem:[#allocation12_spill] sm:$0xff] }
 0x23c   :  { %3179 = vrot.lane.b32.xlu0 %v3178_v23, %s3594_s1  ;;  %v3497_v23 = vld [vmem:[#allocation2 + $0x524] ss:$24 sps:$4 sm:$0xff]  }
 0x23d   :  { %3189 = vrot.lane.b32.xlu1 %v3188_v26, %s3594_s1  ;;  %v3495_v26 = vld [vmem:[#allocation2 + $0x520] ss:$24 sps:$4 sm:$0xff]   ;;  %v3509_v34 = vld [vmem:[#allocation2 + $0x5e4] ss:$24 sps:$4 sm:$0xff]  }
 0x23e   :  { %1457 = vmatpush1.bf16.msra.mxu0 %v3417_v30  ;;  %v3193_v30 = vpack.i.bf16 %v3698_v19, %v3693_v18  ;;  %v3233_v18 = vpack.i.bf16 %v3846_v10, %v3841_v9  ;;  %v3238_v19 = vpack.i.bf16 %v3864_v21, %v3859_v20  ;;  %v4243_v10 = vld [vmem:[#allocation11_spill] sm:$0xff]  ;;  %v4244_v21 = vld [vmem:[#allocation14_spill] sm:$0xff] }
 0x23f   :  { %1458 = vmatprep.subr.bf16.mxu0 %v3422_v13  ;;  %v3198_v13 = vpack.i.bf16 %v3716_v25, %v3711_v24  ;;  %v3243_v24 = vpack.i.bf16 %v3882_v28, %v3877_v27  ;;  %v3248_v25 = vpack.i.bf16 %v3900_v37, %v3895_v33  ;;  %v4245_v33 = vld [vmem:[#allocation15_spill] sm:$0xff] }
 0x240   :  { %3184 = vrot.lane.b32.xlu0 %v3183_v29, %s3594_s1  ;;  %v3500_v29 = vld [vmem:[#allocation2 + $0x554] ss:$24 sps:$4 sm:$0xff]  }
 0x241   :  { %3194 = vrot.lane.b32.xlu1 %v3193_v30, %s3594_s1  ;;  %v3498_v30 = vld [vmem:[#allocation2 + $0x550] ss:$24 sps:$4 sm:$0xff]  }
 0x242   :  { %1459 = vmatpush1.bf16.msra.mxu0 %v3420_v38 }
 0x243   :  { %1460 = vmatprep.subr.bf16.mxu0 %v3425_v42 }
 0x244   :  { %3199 = vrot.lane.b32.xlu0 %v3198_v13, %s3594_s1  ;;  %v3503_v13 = vld [vmem:[#allocation2 + $0x584] ss:$24 sps:$4 sm:$0xff]  }
 0x245   :  { %3204 = vrot.lane.b32.xlu1 %v3203_v1, %s3594_s1  ;;  %v3501_v1 = vld [vmem:[#allocation2 + $0x580] ss:$24 sps:$4 sm:$0xff]  }
 0x246   :  { %1461 = vmatpush1.bf16.msra.mxu0 %v3423_v48 }
 0x247   :  { %1462 = vmatprep.subr.bf16.mxu0 %v3428_v50 }
 0x248   :  { %3209 = vrot.lane.b32.xlu0 %v3208_v2, %s3594_s1 }
 0x249   :  { %3214 = vrot.lane.b32.xlu1 %v3213_v7, %s3594_s1  ;;  %v3506_v7 = vld [vmem:[#allocation2 + $0x5b4] ss:$24 sps:$4 sm:$0xff]  }
 0x24a   :  { %1463 = vmatpush1.bf16.msra.mxu0 %v3426_v61 }
 0x24b   :  { %1464 = vmatprep.subr.bf16.mxu0 %v3431_v56  ;;  %v3462_v56 = vld [vmem:[#allocation2 + $0x310] ss:$24 sps:$4 sm:$0xff]  }
 0x24c   :  { %3219 = vrot.lane.b32.xlu0 %v3218_v8, %s3594_s1 }
 0x24d   :  { %3224 = vrot.lane.b32.xlu1 %v3223_v11, %s3594_s1 }
 0x24e   :  { %1465 = vmatpush1.bf16.msra.mxu0 %v3429_v47 }
 0x24f   :  { %1466 = vmatprep.subr.bf16.mxu0 %v3434_v44  ;;  %v3467_v44 = vld [vmem:[#allocation2 + $0x344] ss:$24 sps:$4 sm:$0xff]  }
 0x250   :  { %3229 = vrot.lane.b32.xlu0 %v3228_v12, %s3594_s1  ;;  %v3504_v12 = vld [vmem:[#allocation2 + $0x5b0] ss:$24 sps:$4 sm:$0xff]  }
 0x251   :  { %3234 = vrot.lane.b32.xlu1 %v3233_v18, %s3594_s1 }
 0x252   :  { %1467 = vmatpush1.bf16.msra.mxu0 %v3432_v31 }
 0x253   :  { %1468 = vmatprep.subr.bf16.mxu0 %v3437_v39  ;;  %v3465_v39 = vld [vmem:[#allocation2 + $0x340] ss:$24 sps:$4 sm:$0xff]  }
 0x254   :  { %3239 = vrot.lane.b32.xlu0 %v3238_v19, %s3594_s1 }
 0x255   :  { %3244 = vrot.lane.b32.xlu1 %v3243_v24, %s3594_s1  ;;  %v4246_v24 = vld [vmem:[#allocation13_spill] sm:$0xff] }
 0x256   :  { %1469 = vmatpush1.bf16.msra.mxu0 %v3435_v43  ;;  %v3470_v43 = vld [vmem:[#allocation2 + $0x374] ss:$24 sps:$4 sm:$0xff]  }
 0x257   :  { %1470 = vmatprep.subr.bf16.mxu0 %v3440_v51  ;;  %v3468_v51 = vld [vmem:[#allocation2 + $0x370] ss:$24 sps:$4 sm:$0xff]  }
 0x258   :  { %3249 = vrot.lane.b32.xlu0 %v3248_v25, %s3594_s1 }
 0x259   :  { %3254 = vrot.lane.b32.xlu1 %v3253_v40, %s3594_s1 }
 0x25a   :  { %1471 = vmatpush1.bf16.msra.mxu0 %v3438_v49  ;;  %v3473_v49 = vld [vmem:[#allocation2 + $0x3a4] ss:$24 sps:$4 sm:$0xff]  }
 0x25b   :  { %1472 = vmatprep.subr.bf16.mxu0 %v3443_v54  ;;  %v3471_v54 = vld [vmem:[#allocation2 + $0x3a0] ss:$24 sps:$4 sm:$0xff]  }
 0x25e   :  { %1473 = vmatpush1.bf16.msra.mxu0 %v3441_v55  ;;  %v3476_v55 = vld [vmem:[#allocation2 + $0x3d4] ss:$24 sps:$4 sm:$0xff]  }
 0x25f   :  { %1474 = vmatprep.subr.bf16.mxu0 %v3446_v63  ;;  %v3474_v63 = vld [vmem:[#allocation2 + $0x3d0] ss:$24 sps:$4 sm:$0xff]  }
 0x262   :  { %1475 = vmatpush1.bf16.msra.mxu0 %v3444_v59  ;;  %v3479_v59 = vld [vmem:[#allocation2 + $0x404] ss:$24 sps:$4 sm:$0xff]  }
 0x263   :  { %1476 = vmatprep.subr.bf16.mxu0 %v3449_v60  ;;  %v3477_v60 = vld [vmem:[#allocation2 + $0x400] ss:$24 sps:$4 sm:$0xff]  }
 0x266   :  { %1477 = vmatpush1.bf16.msra.mxu0 %v3447_v62  ;;  %v3482_v62 = vld [vmem:[#allocation2 + $0x434] ss:$24 sps:$4 sm:$0xff]  }
 0x267   :  { %1478 = vmatprep.subr.bf16.mxu0 %v3452_v6  ;;  %v3480_v6 = vld [vmem:[#allocation2 + $0x430] ss:$24 sps:$4 sm:$0xff]  }
 0x26a   :  { %1479 = vmatpush1.bf16.msra.mxu0 %v3450_v14  ;;  %v3485_v14 = vld [vmem:[#allocation2 + $0x464] ss:$24 sps:$4 sm:$0xff]  }
 0x26b   :  { %1480 = vmatprep.subr.bf16.mxu0 %v3455_v4  ;;  %v3483_v4 = vld [vmem:[#allocation2 + $0x460] ss:$24 sps:$4 sm:$0xff]  }
 0x26e   :  { %1481 = vmatpush1.bf16.msra.mxu0 %v3453_v17  ;;  %v3488_v17 = vld [vmem:[#allocation2 + $0x494] ss:$24 sps:$4 sm:$0xff]  }
 0x26f   :  { %1482 = vmatprep.subr.bf16.mxu0 %v3458_v22  ;;  %v3486_v22 = vld [vmem:[#allocation2 + $0x490] ss:$24 sps:$4 sm:$0xff]  }
 0x272   :  { %1483 = vmatpush1.bf16.msra.mxu0 %v3456_v16  ;;  %v3491_v16 = vld [vmem:[#allocation2 + $0x4c4] ss:$24 sps:$4 sm:$0xff]  }
 0x273   :  { %1484 = vmatprep.subr.bf16.mxu0 %v3461_v36  ;;  %v3489_v36 = vld [vmem:[#allocation2 + $0x4c0] ss:$24 sps:$4 sm:$0xff]  }
 0x276   :  { %1485 = vmatpush1.bf16.msra.mxu0 %v3459_v15  ;;  %v3494_v15 = vld [vmem:[#allocation2 + $0x4f4] ss:$24 sps:$4 sm:$0xff]  }
 0x277   :  { %1495 = vmatprep.subr.bf16.mxu0 %v3464_v5  ;;  %v3492_v5 = vld [vmem:[#allocation2 + $0x4f0] ss:$24 sps:$4 sm:$0xff]  }
 0x2ae   :  { %v3180_v8 = vpop.permute.xlu0 %3179 }
 0x2af   :  { %v3190_v11 = vpop.permute.xlu1 %3189  ;;  %v3182_v18 = vunpack.i.h.bf16 %v3180_v8  ;;  %v3181_v19 = vunpack.i.l.bf16 %v3180_v8 }
 0x2b0   :  { %v3192_v35 = vunpack.i.h.bf16 %v3190_v11  ;;  %v3191_v40 = vunpack.i.l.bf16 %v3190_v11 }
 0x30c   :  { %v901_v41 = vpop.f32.mrb[6].mxu0  ;;  %v4016_v45 = vpop.f32.mrb[6].mxu1 }
 0x30d   :  { %v980_v52 = vrot.slane %v901_v41, %v4241_v46  ;;  %v903_v53 = vpop.f32.mrb[7].mxu0  ;;  %v974_v57 = vpop.f32.mrb[7].mxu1  ;;  %v1000_v20 = vrot.slane %v901_v41, %v4243_v10  ;;  %v988_v2 = vrot.slane %v4016_v45, %v4241_v46  ;;  %v3084_v41 = vpack.c.bf16 %v3182_v18, %v3181_v19 }
 0x30e   :  { %v984_v58 = vrot.slane %v903_v53, %v4241_v46  ;;  %v992_v0 = vrot.slane %v974_v57, %v4241_v46  ;;  %v1004_v28 = vrot.slane %v903_v53, %v4243_v10  ;;  %v1012_v38 = vrot.slane %v974_v57, %v4243_v10  ;;  %v3185_v53 = vpop.permute.xlu0 %3184  ;;  %v3195_v57 = vpop.permute.xlu1 %3194 }
 0x30f   :  { %v993_v9 = vmul.f32 %v980_v52, %v4242_v3  ;;  %v995_v25 = vmul.f32 %v988_v2, %v4246_v24  ;;  %v1008_v52 = vrot.slane %v4016_v45, %v4243_v10  ;;  %v3186_v3 = vunpack.i.l.bf16 %v3185_v53  ;;  %3085 = vmatprep.subr.bf16.mxu1 %v3084_v41 }
 0x310   :  { %v994_v27 = vmul.f32 %v984_v58, %v4244_v21  ;;  %v996_v37 = vmul.f32 %v992_v0, %v4245_v33  ;;  %v3507_v58 = vld [vmem:[#allocation2 + $0x5e0] ss:$24 sps:$4 sm:$0xff]   ;;  %v3187_v0 = vunpack.i.h.bf16 %v3185_v53 }
 0x311   :  { %v1013_v42 = vadd.f32 %v1000_v20, %v993_v9  ;;  %v3197_v9 = vunpack.i.h.bf16 %v3195_v57  ;;  %v3196_v20 = vunpack.i.l.bf16 %v3195_v57  ;;  %v1015_v21 = vadd.f32 %v1008_v52, %v995_v25  ;;  %v2676_v52 = vld [vmem:[%s4218_s2 + $0x1] ss:$8 sm:$0x3] }
 0x312   :  { %v1014_v48 = vadd.f32 %v1004_v28, %v994_v27  ;;  %v1016_v50 = vadd.f32 %v1012_v38, %v996_v37  ;;  %v3088_v27 = vpack.c.bf16 %v3192_v35, %v3191_v40  ;;  %v3086_v28 = vpack.c.bf16 %v3187_v0, %v3186_v3  ;;  %v3200_v37 = vpop.permute.xlu0 %3199  ;;  %v3205_v38 = vpop.permute.xlu1 %3204 }
 0x313   :  { %v1119_v47 = vpack.c.bf16 %v1013_v42, %v1013_v42  ;;  %v3090_v33 = vpack.c.bf16 %v3197_v9, %v3196_v20  ;;  %v3202_v42 = vunpack.i.h.bf16 %v3200_v37  ;;  %v3201_v45 = vunpack.i.l.bf16 %v3200_v37 }
 0x314   :  { %v1120_v61 = vpack.c.bf16 %v1014_v48, %v1014_v48  ;;  %v1122_v31 = vpack.c.bf16 %v1016_v50, %v1016_v50  ;;  %3087 = vmatpush3.bf16.msra.mxu1 %v3086_v28  ;;  %v3207_v48 = vunpack.i.h.bf16 %v3205_v38  ;;  %v3206_v50 = vunpack.i.l.bf16 %v3205_v38 }
 0x315   :  { %3089 = vmatprep.subr.bf16.mxu1 %v3088_v27  ;;  %v1127_v53 = vrot.slane %v2676_v52, %v4241_v46  ;;  %v1131_v57 = vrot.slane %v2676_v52, %v4243_v10 }
 0x316   :  { %1486 = vmatprep.mubr.bf16.mxu0 %v1120_v61  ;;  %v1121_v61 = vpack.c.bf16 %v1015_v21, %v1015_v21 }
 0x317   :  { %1487 = vmatmul.mubr.bf16.vlgmr.msra.gmra.mrb[8].mxu0 %v1119_v47  ;;  %v3094_v47 = vpack.c.bf16 %v3207_v48, %v3206_v50 }
 0x318   :  { %1496 = vmatpush1.bf16.msra.mxu0 %v3462_v56  ;;  %1527 = vmatprep.mubr.bf16.mxu0 %v1122_v31  ;;  %v3092_v56 = vpack.c.bf16 %v3202_v42, %v3201_v45  ;;  %v3215_v31 = vpop.permute.xlu1 %3214 }
 0x319   :  { %1497 = vmatprep.subr.bf16.mxu0 %v3467_v44  ;;  %v3210_v44 = vpop.permute.xlu0 %3209  ;;  %3091 = vmatpush3.bf16.msra.mxu1 %v3090_v33 }
 0x31a   :  { %3093 = vmatprep.subr.bf16.mxu1 %v3092_v56 }
 0x31c   :  { %1498 = vmatpush1.bf16.msra.mxu0 %v3465_v39  ;;  %v3212_v39 = vunpack.i.h.bf16 %v3210_v44 }
 0x31d   :  { %1499 = vmatprep.subr.bf16.mxu0 %v3470_v43  ;;  %v3211_v43 = vunpack.i.l.bf16 %v3210_v44  ;;  %3095 = vmatpush3.bf16.msra.mxu1 %v3094_v47 }
 0x320   :  { %1500 = vmatpush1.bf16.msra.mxu0 %v3468_v51  ;;  %v3217_v51 = vunpack.i.h.bf16 %v3215_v31 }
 0x321   :  { %1501 = vmatprep.subr.bf16.mxu0 %v3473_v49  ;;  %v3216_v49 = vunpack.i.l.bf16 %v3215_v31 }
 0x324   :  { %1502 = vmatpush1.bf16.msra.mxu0 %v3471_v54  ;;  %v3096_v54 = vpack.c.bf16 %v3212_v39, %v3211_v43 }
 0x325   :  { %1503 = vmatprep.subr.bf16.mxu0 %v3476_v55  ;;  %v3098_v55 = vpack.c.bf16 %v3217_v51, %v3216_v49 }
 0x326   :  { %3097 = vmatprep.subr.bf16.mxu1 %v3096_v54 }
 0x327   :  { %3099 = vmatpush3.bf16.msra.mxu1 %v3098_v55 }
 0x328   :  { %1504 = vmatpush1.bf16.msra.mxu0 %v3474_v63  ;;  %v3220_v63 = vpop.permute.xlu0 %3219 }
 0x329   :  { %1505 = vmatprep.subr.bf16.mxu0 %v3479_v59  ;;  %v3222_v59 = vunpack.i.h.bf16 %v3220_v63 }
 0x32c   :  { %1506 = vmatpush1.bf16.msra.mxu0 %v3477_v60  ;;  %v3221_v60 = vunpack.i.l.bf16 %v3220_v63 }
 0x32d   :  { %1507 = vmatprep.subr.bf16.mxu0 %v3482_v62  ;;  %v3225_v62 = vpop.permute.xlu1 %3224 }
 0x330   :  { %1508 = vmatpush1.bf16.msra.mxu0 %v3480_v6  ;;  %v3227_v6 = vunpack.i.h.bf16 %v3225_v62 }
 0x331   :  { %1509 = vmatprep.subr.bf16.mxu0 %v3485_v14  ;;  %v3226_v14 = vunpack.i.l.bf16 %v3225_v62 }
 0x334   :  { %1510 = vmatpush1.bf16.msra.mxu0 %v3483_v4  ;;  %v3100_v4 = vpack.c.bf16 %v3222_v59, %v3221_v60 }
 0x335   :  { %1511 = vmatprep.subr.bf16.mxu0 %v3488_v17  ;;  %v3102_v17 = vpack.c.bf16 %v3227_v6, %v3226_v14 }
 0x336   :  { %3101 = vmatprep.subr.bf16.mxu1 %v3100_v4 }
 0x337   :  { %3103 = vmatpush3.bf16.msra.mxu1 %v3102_v17 }
 0x338   :  { %1512 = vmatpush1.bf16.msra.mxu0 %v3486_v22  ;;  %v3230_v22 = vpop.permute.xlu0 %3229 }
 0x339   :  { %1513 = vmatprep.subr.bf16.mxu0 %v3491_v16  ;;  %v3232_v16 = vunpack.i.h.bf16 %v3230_v22 }
 0x33c   :  { %1514 = vmatpush1.bf16.msra.mxu0 %v3489_v36  ;;  %v3231_v36 = vunpack.i.l.bf16 %v3230_v22 }
 0x33d   :  { %1515 = vmatprep.subr.bf16.mxu0 %v3494_v15  ;;  %v3235_v15 = vpop.permute.xlu1 %3234 }
 0x340   :  { %1516 = vmatpush1.bf16.msra.mxu0 %v3492_v5  ;;  %v3237_v5 = vunpack.i.h.bf16 %v3235_v15 }
 0x341   :  { %1517 = vmatprep.subr.bf16.mxu0 %v3497_v23  ;;  %v3236_v23 = vunpack.i.l.bf16 %v3235_v15  ;;  %v3245_v2 = vpop.permute.xlu1 %3244 }
 0x342   :  { %v3246_v8 = vunpack.i.l.bf16 %v3245_v2 }
 0x344   :  { %1518 = vmatpush1.bf16.msra.mxu0 %v3495_v26  ;;  %v3104_v26 = vpack.c.bf16 %v3232_v16, %v3231_v36 }
 0x345   :  { %1519 = vmatprep.subr.bf16.mxu0 %v3500_v29  ;;  %v3106_v29 = vpack.c.bf16 %v3237_v5, %v3236_v23  ;;  %v3255_v25 = vpop.permute.xlu1 %3254 }
 0x346   :  { %3105 = vmatprep.subr.bf16.mxu1 %v3104_v26  ;;  %v3256_v35 = vunpack.i.l.bf16 %v3255_v25  ;;  %v1116_v26 = vld [vmem:[%s4218_s2 + $0x48] sm:$0xff] }
 0x347   :  { %3107 = vmatpush3.bf16.msra.mxu1 %v3106_v29  ;;  %v1118_v29 = vld [vmem:[%s4218_s2 + $0x68] sm:$0xff] }
 0x348   :  { %1520 = vmatpush1.bf16.msra.mxu0 %v3498_v30  ;;  %v3240_v30 = vpop.permute.xlu0 %3239 }
 0x349   :  { %1521 = vmatprep.subr.bf16.mxu0 %v3503_v13  ;;  %v3242_v13 = vunpack.i.h.bf16 %v3240_v30 }
 0x34c   :  { %1522 = vmatpush1.bf16.msra.mxu0 %v3501_v1  ;;  %v3241_v1 = vunpack.i.l.bf16 %v3240_v30  ;;  %v3250_v18 = vpop.permute.xlu0 %3249  ;;  %v3116_v30 = vpack.c.bf16 %v1118_v29, %v1116_v26  ;;  %v1929_v26 = vld [vmem:[%s4219_s3 + $0x78] sm:$0xff] }
 0x34d   :  { %1523 = vmatprep.subr.bf16.mxu0 %v3506_v7  ;;  %v3247_v7 = vunpack.i.h.bf16 %v3245_v2  ;;  %v3252_v19 = vunpack.i.h.bf16 %v3250_v18  ;;  %v3251_v24 = vunpack.i.l.bf16 %v3250_v18 }
 0x34e   :  { %v3108_v11 = vpack.c.bf16 %v3242_v13, %v3241_v1  ;;  %v1115_v13 = vld [vmem:[%s4218_s2 + $0x40] sm:$0xff] }
 0x34f   :  { %v3112_v40 = vpack.c.bf16 %v3252_v19, %v3251_v24  ;;  %v1117_v1 = vld [vmem:[%s4218_s2 + $0x60] sm:$0xff] }
 0x350   :  { %1524 = vmatpush1.bf16.msra.mxu0 %v3504_v12  ;;  %v3110_v12 = vpack.c.bf16 %v3247_v7, %v3246_v8  ;;  %3109 = vmatprep.subr.bf16.mxu1 %v3108_v11  ;;  %v3118_v2 = vpack.c.bf16 %v1117_v1, %v1115_v13  ;;  %v3510_v7 = vld [vmem:[#allocation2 + $0x480] ss:$24 sps:$4 sm:$0xff]  }
 0x351   :  { %1525 = vmatprep.subr.bf16.mxu0 %v3509_v34  ;;  %v3257_v34 = vunpack.i.h.bf16 %v3255_v25 }
 0x352   :  { %3111 = vmatpush3.bf16.msra.mxu1 %v3110_v12 }
 0x353   :  { %v3114_v41 = vpack.c.bf16 %v3257_v34, %v3256_v35  ;;  %3113 = vmatprep.subr.bf16.mxu1 %v3112_v40 }
 0x354   :  { %1526 = vmatpush1.bf16.msra.mxu0 %v3507_v58 }
 0x356   :  { %3115 = vmatpush3.bf16.msra.mxu1 %v3114_v41 }
 0x357   :  { %1528 = vmatmul.mubr.bf16.vlgmr.msra.gmra.mrb[8].mxu0 %v1121_v61  ;;  %3117 = vmatprep.subr.bf16.mxu1 %v3116_v30 }
 0x358   :  { %3017 = vmatprep.mubr.msk.f32.mxu0 %vm3597_vm4, %v3593_v32 }
 0x42a   :  { %v1529_v58 = vpop.f32.mrb[8].mxu0 }
 0x42b   :  { %v3162_v0 = vadd.f32 %v1529_v58, %v1127_v53  ;;  %v1531_v3 = vpop.f32.mrb[9].mxu0  ;;  %v3511_v58 = vld [vmem:[#allocation2 + $0x300] ss:$24 sps:$4 sm:$0xff]  }
 0x42c   :  { %v3163_v9 = vadd.f32 %v1531_v3, %v1131_v57  ;;  %v1533_v20 = vpop.f32.mrb[10].mxu0 }
 0x42d   :  { %v4037_v21 = vmax.f32 %v3162_v0, 0.0  ;;  %v1534_v27 = vpop.f32.mrb[11].mxu0  ;;  %v3512_v0 = vld [vmem:[#allocation2 + $0x4b0] ss:$24 sps:$4 sm:$0xff]   ;;  %v3514_v20 = vld [vmem:[#allocation2 + $0x4e0] ss:$24 sps:$4 sm:$0xff]  }
 0x42e   :  { %v4039_v28 = vmax.f32 %v3163_v9, 0.0  ;;  %v3513_v9 = vld [vmem:[#allocation2 + $0x330] ss:$24 sps:$4 sm:$0xff]   ;;  %v3515_v27 = vld [vmem:[#allocation2 + $0x360] ss:$24 sps:$4 sm:$0xff]  }
 0x42f   :  { %v1538_v33 = vsel %vm607_vm0, %v4037_v21, 0.0  ;;  %v1552_v37 = vmul.f32 %v4037_v21, %v4037_v21 }
 0x430   :  { %v1539_v38 = vrot.slane %v1538_v33, 4  ;;  %v1545_v42 = vsel %vm607_vm0, %v4039_v28, 0.0  ;;  %v1553_v45 = vmul.f32 %v4039_v28, %v4039_v28 }
 0x431   :  { %v1554_v48 = vsel %vm607_vm0, %v1552_v37, 0.0  ;;  %v1546_v50 = vrot.slane %v1545_v42, 4  ;;  %v3517_v37 = vld [vmem:[#allocation2 + $0x390] ss:$24 sps:$4 sm:$0xff]  }
 0x432   :  { %v1540_v61 = vadd.f32 %v1539_v38, %v1538_v33  ;;  %v1555_v56 = vrot.slane %v1554_v48, 4  ;;  %v1561_v47 = vsel %vm607_vm0, %v1553_v45, 0.0  ;;  %v3516_v33 = vld [vmem:[#allocation2 + $0x510] ss:$24 sps:$4 sm:$0xff]   ;;  %v3518_v38 = vld [vmem:[#allocation2 + $0x540] ss:$24 sps:$4 sm:$0xff]  }
 0x433   :  { %v1547_v44 = vadd.f32 %v1546_v50, %v1545_v42  ;;  %v1562_v31 = vrot.slane %v1561_v47, 4  ;;  %v3519_v42 = vld [vmem:[#allocation2 + $0x3c0] ss:$24 sps:$4 sm:$0xff]   ;;  %v3520_v45 = vld [vmem:[#allocation2 + $0x570] ss:$24 sps:$4 sm:$0xff]  }
 0x434   :  { %v1541_v39 = vrot.slane %v1540_v61, 2  ;;  %v1556_v43 = vadd.f32 %v1555_v56, %v1554_v48  ;;  %v3521_v48 = vld [vmem:[#allocation2 + $0x3f0] ss:$24 sps:$4 sm:$0xff]   ;;  %v3522_v50 = vld [vmem:[#allocation2 + $0x5a0] ss:$24 sps:$4 sm:$0xff]  }
 0x435   :  { %v1548_v51 = vrot.slane %v1547_v44, 2  ;;  %v1563_v49 = vadd.f32 %v1562_v31, %v1561_v47  ;;  %v3524_v56 = vld [vmem:[#allocation2 + $0x5d0] ss:$24 sps:$4 sm:$0xff]  }
 0x436   :  { %v1542_v54 = vadd.f32 %v1541_v39, %v1540_v61  ;;  %v1557_v55 = vrot.slane %v1556_v43, 2  ;;  %v3523_v61 = vld [vmem:[#allocation2 + $0x420] ss:$24 sps:$4 sm:$0xff]   ;;  %v3525_v47 = vld [vmem:[#allocation2 + $0x450] ss:$24 sps:$4 sm:$0xff]  }
 0x437   :  { %v1549_v63 = vadd.f32 %v1548_v51, %v1547_v44  ;;  %v1564_v59 = vrot.slane %v1563_v49, 2  ;;  %v1914_v44 = vld [vmem:[%s4219_s3] sm:$0xff]  ;;  %v1915_v31 = vld [vmem:[%s4219_s3 + $0x8] sm:$0xff]  ;;  %v1916_v39 = vld [vmem:[%s4219_s3 + $0x10] sm:$0xff] }
 0x438   :  { %v1558_v60 = vadd.f32 %v1557_v55, %v1556_v43  ;;  %v1543_v14 = vrot.slane %v1542_v54, 1  ;;  %v4076_v43 = vpack.i.bf16 %v1915_v31, %v1914_v44  ;;  %v1917_v51 = vld [vmem:[%s4219_s3 + $0x18] sm:$0xff]  ;;  %v3595_v55 = vmov 0.0|0.0  }
 0x439   :  { %v1550_v62 = vrot.slane %v1549_v63, 1  ;;  %v1565_v6 = vadd.f32 %v1564_v59, %v1563_v49  ;;  %v1918_v49 = vld [vmem:[%s4219_s3 + $0x20] sm:$0xff]  ;;  %3150 = vmatprep.subr.bf16.mxu0 %v3595_v55  ;;  %v1920_v59 = vld [vmem:[%s4219_s3 + $0x30] sm:$0xff] }
 0x43a   :  { %v1559_v4 = vrot.slane %v1558_v60, 1  ;;  %v1544_v15 = vadd.f32 %v1543_v14, %v1542_v54  ;;  %v1919_v54 = vld [vmem:[%s4219_s3 + $0x28] sm:$0xff]  ;;  %3259 = vrot.lane.b32.xlu0 %v4076_v43, %s3596_s28  ;;  %v1922_v14 = vld [vmem:[%s4219_s3 + $0x40] sm:$0xff] }
 0x43b   :  { %v1566_v17 = vrot.slane %v1565_v6, 1  ;;  %v1551_v16 = vadd.f32 %v1550_v62, %v1549_v63  ;;  %v4089_v63 = vpack.i.bf16 %v1917_v51, %v1916_v39  ;;  %v4098_v62 = vpack.i.bf16 %v1919_v54, %v1918_v49 }
 0x43c   :  { %v1560_v22 = vadd.f32 %v1559_v4, %v1558_v60  ;;  %v1921_v60 = vld [vmem:[%s4219_s3 + $0x38] sm:$0xff]  ;;  %v1923_v4 = vld [vmem:[%s4219_s3 + $0x48] sm:$0xff] }
 0x43d   :  { %v1567_v36 = vadd.f32 %v1566_v17, %v1565_v6  ;;  %3264 = vrot.lane.b32.xlu1 %v4089_v63, %s3596_s28  ;;  %v4101_v6 = vpack.i.bf16 %v1921_v60, %v1920_v59  ;;  %v1924_v17 = vld [vmem:[%s4219_s3 + $0x50] sm:$0xff] }
 0x43e   :  { %v1568_v23 = vsel %vm668_vm1, %v1544_v15, %v1560_v22  ;;  %v1925_v22 = vld [vmem:[%s4219_s3 + $0x58] sm:$0xff]  ;;  %3269 = vrot.lane.b32.xlu0 %v4098_v62, %s3596_s28  ;;  %v1926_v15 = vld [vmem:[%s4219_s3 + $0x60] sm:$0xff] }
 0x43f   :  { %v1569_v5 = vsel %vm668_vm1, %v1551_v16, %v1567_v36  ;;  %v3278_v16 = vpack.i.bf16 %v1923_v4, %v1922_v14  ;;  %v3283_v36 = vpack.i.bf16 %v1925_v22, %v1924_v17  ;;  %v1913_v4 = vld [vmem:[%s4218_s2 + $0x2] ss:$0 sm:$0xff] }
 0x440   :  { %1762 = vmatprep.mubr.f32.mxu1 %v1569_v5  ;;  %v1927_v5 = vld [vmem:[%s4219_s3 + $0x68] sm:$0xff] }
 0x441   :  { %1763 = vmatmul.mubr.f32.vlgmr.msra.gmra.mrb[8].mxu1 %v1568_v23  ;;  %3274 = vrot.lane.b32.xlu1 %v4101_v6, %s3596_s28  ;;  %v1928_v23 = vld [vmem:[%s4219_s3 + $0x70] sm:$0xff]  ;;  %v3288_v29 = vpack.i.bf16 %v1927_v5, %v1926_v15 }
 0x442   :  { %1854 = vmatprep.mubr.f32.mxu1 %v3593_v32  ;;  %3119 = vmatpush1.bf16.msra.mxu1 %v3118_v2  ;;  %v3293_v30 = vpack.i.bf16 %v1929_v26, %v1928_v23 }
 0x443   :  { %2873 = vmatprep.subr.bf16.mxu1 %v3510_v7  ;;  %3279 = vrot.lane.b32.xlu0 %v3278_v16, %s3596_s28 }
 0x445   :  { %3284 = vrot.lane.b32.xlu1 %v3283_v36, %s3596_s28 }
 0x447   :  { %3289 = vrot.lane.b32.xlu0 %v3288_v29, %s3596_s28 }
 0x449   :  { %3294 = vrot.lane.b32.xlu1 %v3293_v30, %s3596_s28 }
 0x44b   :  { %3299 = vrot.lane.b32.xlu0 %v4076_v43, %s3598_s26 }
 0x44d   :  { %3304 = vrot.lane.b32.xlu1 %v4089_v63, %s3598_s26 }
 0x44f   :  { %3309 = vrot.lane.b32.xlu0 %v4098_v62, %s3598_s26 }
 0x451   :  { %3314 = vrot.lane.b32.xlu1 %v4101_v6, %s3598_s26 }
 0x4ac   :  { %v3260_v7 = vpop.permute.xlu0 %3259 }
 0x514   :  { %v2870_v8 = vpop.f32.mrb[8].mxu1 }
 0x515   :  { %v2871_v11 = vpop.f32.mrb[9].mxu1 }
 0x516   :  { %v2872_v12 = vadd.f32 %v2871_v11, %v2870_v8 }
 0x518   :  { %v1768_v18 = vmul.f32 0.03125, %v2872_v12 }
 0x51a   :  { %v1769_v19 = vmul.f32 %v1768_v18, %v1768_v18  ;;  %v1777_v41 = vsub.f32 0.0, %v1768_v18 }
 0x51c   :  { %v1771_v24 = vrot.slane %v1769_v19, 7 }
 0x51e   :  { %v1773_v25 = vsub.f32 %v1768_v18, %v1771_v24  ;;  %v3262_v24 = vunpack.i.h.bf16 %v3260_v7 }
 0x520   :  { %v1774_v34 = vmax.f32 %v1773_v25, 0.0  ;;  %v3261_v25 = vunpack.i.l.bf16 %v3260_v7 }
 0x522   :  { %v1775_v35 = vadd.f32 1e-05, %v1774_v34 }
 0x524   :  { %3536 = vrsqrt.f32 %v1775_v35  ;;  %v3265_v35 = vpop.permute.xlu1 %3264 }
 0x52e   :  { %v3537_v40 = vpop.eup %3536 }
 0x52f   :  { %v1779_v52 = vrot.slane %v3537_v40, 1 }
 0x531   :  { %v1781_v53 = vmul.f32 %v1779_v52, %v1777_v41 }
 0x533   :  { %v1783_v57 = vrot.slane %v1781_v53, 7  ;;  %v3267_v53 = vunpack.i.h.bf16 %v3265_v35 }
 0x535   :  { %v1785_v3 = vsel %vm668_vm1, %v1779_v52, %v1783_v57  ;;  %v3121_v52 = vpack.c.bf16 %v3262_v24, %v3261_v25  ;;  %v3266_v57 = vunpack.i.l.bf16 %v3265_v35  ;;  %v1930_v35 = vld [vmem:[%s4218_s2 + $0x80] sm:$0xff] }
 0x536   :  { %2741 = vmatmul.mubr.msk.f32.vlgmr.msra.gmra.mrb[10].mxu1 %vm1786_vm3, %v1785_v3 }
 0x537   :  { %2874 = vmatpush3.bf16.msra.mxu1 %v3511_v58 }
 0x538   :  { %2875 = vmatprep.subr.bf16.mxu1 %v3512_v0  ;;  %v3270_v0 = vpop.permute.xlu0 %3269 }
 0x539   :  { %v3272_v3 = vunpack.i.h.bf16 %v3270_v0 }
 0x53b   :  { %2876 = vmatpush3.bf16.msra.mxu1 %v3513_v9  ;;  %v3271_v9 = vunpack.i.l.bf16 %v3270_v0 }
 0x53c   :  { %2877 = vmatprep.subr.bf16.mxu1 %v3514_v20 }
 0x53d   :  { %v3127_v20 = vpack.c.bf16 %v3272_v3, %v3271_v9 }
 0x53f   :  { %2878 = vmatpush3.bf16.msra.mxu1 %v3515_v27 }
 0x540   :  { %2879 = vmatprep.subr.bf16.mxu1 %v3516_v33 }
 0x543   :  { %2880 = vmatpush3.bf16.msra.mxu1 %v3517_v37 }
 0x544   :  { %2881 = vmatprep.subr.bf16.mxu1 %v3518_v38  ;;  %v3280_v38 = vpop.permute.xlu0 %3279 }
 0x547   :  { %2882 = vmatpush3.bf16.msra.mxu1 %v3519_v42  ;;  %v3282_v42 = vunpack.i.h.bf16 %v3280_v38 }
 0x548   :  { %2883 = vmatprep.subr.bf16.mxu1 %v3520_v45  ;;  %v3281_v45 = vunpack.i.l.bf16 %v3280_v38  ;;  %v3290_v44 = vpop.permute.xlu0 %3289 }
 0x549   :  { %v3292_v31 = vunpack.i.h.bf16 %v3290_v44  ;;  %v3291_v39 = vunpack.i.l.bf16 %v3290_v44  ;;  %v3530_v44 = vld [vmem:[#allocation2 + $0x3c4] ss:$24 sps:$4 sm:$0xff]  }
 0x54b   :  { %2884 = vmatpush3.bf16.msra.mxu1 %v3521_v48  ;;  %v3133_v48 = vpack.c.bf16 %v3282_v42, %v3281_v45  ;;  %v3139_v59 = vpack.c.bf16 %v3292_v31, %v3291_v39  ;;  %v3531_v31 = vld [vmem:[#allocation2 + $0x3f4] ss:$24 sps:$4 sm:$0xff]   ;;  %v3532_v39 = vld [vmem:[#allocation2 + $0x424] ss:$24 sps:$4 sm:$0xff]  }
 0x54c   :  { %2885 = vmatprep.subr.bf16.mxu1 %v3522_v50 }
 0x54f   :  { %2886 = vmatpush3.bf16.msra.mxu1 %v3523_v61 }
 0x550   :  { %2887 = vmatprep.subr.bf16.mxu1 %v3524_v56 }
 0x553   :  { %2888 = vmatpush3.bf16.msra.mxu1 %v3525_v47 }
 0x554   :  { %3120 = vmatprep.subr.bf16.mxu1 %v3595_v55 }
 0x609   :  { %v1856_v13 = vpop.f32.mrb[10].mxu1 }
 0x60a   :  { %v1864_v1 = vrot.slane %v1856_v13, %v4241_v46  ;;  %v1858_v2 = vpop.f32.mrb[11].mxu1  ;;  %v1874_v12 = vrot.slane %v1856_v13, %v4243_v10 }
 0x60b   :  { %v1868_v8 = vrot.slane %v1858_v2, %v4241_v46  ;;  %v1878_v19 = vrot.slane %v1858_v2, %v4243_v10 }
 0x60c   :  { %v1869_v11 = vmul.f32 %v1864_v1, %v4037_v21  ;;  %v3124_v21 = vpack.c.bf16 %v3267_v53, %v3266_v57  ;;  %v1933_v53 = vld [vmem:[%s4218_s2 + $0xe0] sm:$0xff] }
 0x60d   :  { %v1870_v18 = vmul.f32 %v1868_v8, %v4039_v28  ;;  %v3275_v28 = vpop.permute.xlu1 %3274 }
 0x60e   :  { %v1879_v34 = vadd.f32 %v1874_v12, %v1869_v11  ;;  %v3277_v27 = vunpack.i.h.bf16 %v3275_v28  ;;  %v3276_v33 = vunpack.i.l.bf16 %v3275_v28 }
 0x60f   :  { %v1880_v40 = vadd.f32 %v1878_v19, %v1870_v18 }
 0x610   :  { %v1934_v58 = vpack.c.bf16 %v1879_v34, %v1879_v34  ;;  %v3130_v37 = vpack.c.bf16 %v3277_v27, %v3276_v33 }
 0x611   :  { %v1935_v41 = vpack.c.bf16 %v1880_v40, %v1880_v40  ;;  %v3285_v50 = vpop.permute.xlu1 %3284  ;;  %v1931_v40 = vld [vmem:[%s4218_s2 + $0xa0] sm:$0xff] }
 0x612   :  { %v3287_v61 = vunpack.i.h.bf16 %v3285_v50  ;;  %v3286_v56 = vunpack.i.l.bf16 %v3285_v50 }
 0x613   :  { %2064 = vmatprep.mubr.bf16.mxu1 %v1935_v41  ;;  %v3145_v41 = vpack.c.bf16 %v1931_v40, %v1930_v35 }
 0x614   :  { %2065 = vmatmul.mubr.bf16.vlgmr.msra.gmra.mrb[12].mxu1 %v1934_v58  ;;  %v3136_v47 = vpack.c.bf16 %v3287_v61, %v3286_v56  ;;  %v3527_v61 = vld [vmem:[#allocation2 + $0x334] ss:$24 sps:$4 sm:$0xff]   ;;  %v3528_v56 = vld [vmem:[#allocation2 + $0x364] ss:$24 sps:$4 sm:$0xff]  }
 0x615   :  { %3122 = vmatpush3.bf16.msra.mxu1 %v3121_v52  ;;  %v3295_v51 = vpop.permute.xlu1 %3294  ;;  %2967 = vmatprep.mubr.msk.f32.mxu1 %vm3597_vm4, %v3593_v32  ;;  %v1932_v52 = vld [vmem:[%s4218_s2 + $0xc0] sm:$0xff] }
 0x616   :  { %3123 = vmatprep.subr.bf16.mxu1 %v3595_v55  ;;  %v3297_v49 = vunpack.i.h.bf16 %v3295_v51  ;;  %v3296_v54 = vunpack.i.l.bf16 %v3295_v51  ;;  %v3148_v57 = vpack.c.bf16 %v1933_v53, %v1932_v52  ;;  %v3533_v51 = vld [vmem:[#allocation2 + $0x454] ss:$24 sps:$4 sm:$0xff]  }
 0x618   :  { %v3142_v60 = vpack.c.bf16 %v3297_v49, %v3296_v54 }
 0x619   :  { %3125 = vmatpush3.bf16.msra.mxu1 %v3124_v21  ;;  %v3305_v63 = vpop.permute.xlu1 %3304 }
 0x61a   :  { %3126 = vmatprep.subr.bf16.mxu1 %v3595_v55  ;;  %v3306_v62 = vunpack.i.l.bf16 %v3305_v63 }
 0x61d   :  { %3128 = vmatpush3.bf16.msra.mxu1 %v3127_v20 }
 0x61e   :  { %3129 = vmatprep.subr.bf16.mxu1 %v3595_v55 }
 0x621   :  { %3131 = vmatpush3.bf16.msra.mxu1 %v3130_v37 }
 0x622   :  { %3132 = vmatprep.subr.bf16.mxu1 %v3595_v55 }
 0x625   :  { %3134 = vmatpush3.bf16.msra.mxu1 %v3133_v48  ;;  %v3526_v48 = vld [vmem:[#allocation2 + $0x304] ss:$24 sps:$4 sm:$0xff]  }
 0x626   :  { %3135 = vmatprep.subr.bf16.mxu1 %v3595_v55 }
 0x629   :  { %3137 = vmatpush3.bf16.msra.mxu1 %v3136_v47  ;;  %v3529_v47 = vld [vmem:[#allocation2 + $0x394] ss:$24 sps:$4 sm:$0xff]  }
 0x62a   :  { %3138 = vmatprep.subr.bf16.mxu1 %v3595_v55 }
 0x62d   :  { %3140 = vmatpush3.bf16.msra.mxu1 %v3139_v59 }
 0x62e   :  { %3141 = vmatprep.subr.bf16.mxu1 %v3595_v55 }
 0x631   :  { %3143 = vmatpush3.bf16.msra.mxu1 %v3142_v60 }
 0x632   :  { %3144 = vmatprep.subr.bf16.mxu1 %v3595_v55 }
 0x6e7   :  { %v2889_v14 = vpop.f32.mrb[12].mxu1 }
 0x6e8   :  { %v2890_v17 = vpop.f32.mrb[13].mxu1 }
 0x6e9   :  { %v2891_v22 = vadd.f32 %v2890_v17, %v2889_v14  ;;  %v2892_v16 = vpop.f32.mrb[14].mxu1  ;;  %v3300_v17 = vpop.permute.xlu0 %3299 }
 0x6ea   :  { %v2893_v36 = vpop.f32.mrb[15].mxu1  ;;  %v3301_v43 = vunpack.i.l.bf16 %v3300_v17 }
 0x6eb   :  { %v2067_v15 = vadd.f32 %v2891_v22, %v1913_v4  ;;  %v3302_v22 = vunpack.i.h.bf16 %v3300_v17  ;;  %v3307_v36 = vunpack.i.h.bf16 %v3305_v63 }
 0x6ed   :  { %v4150_v5 = vmax.f32 %v2067_v15, 0.0  ;;  %v3151_v16 = vpack.c.bf16 %v3302_v22, %v3301_v43  ;;  %v3154_v6 = vpack.c.bf16 %v3307_v36, %v3306_v62  ;;  %v3310_v15 = vpop.permute.xlu0 %3309 }
 0x6ef   :  { %v2073_v23 = vsel %vm607_vm0, %v4150_v5, 0.0  ;;  %v2080_v26 = vmul.f32 %v4150_v5, %v4150_v5  ;;  %3152 = vmatpush3.bf16.msra.mxu0 %v3151_v16 }
 0x6f0   :  { %v2074_v29 = vrot.slane %v2073_v23, 4  ;;  %3153 = vmatprep.subr.bf16.mxu0 %v3595_v55 }
 0x6f1   :  { %v2081_v30 = vsel %vm607_vm0, %v2080_v26, 0.0  ;;  %v3311_v26 = vunpack.i.l.bf16 %v3310_v15 }
 0x6f2   :  { %v2075_v13 = vadd.f32 %v2074_v29, %v2073_v23  ;;  %v2082_v1 = vrot.slane %v2081_v30, 4  ;;  %v3312_v23 = vunpack.i.h.bf16 %v3310_v15  ;;  %v3315_v29 = vpop.permute.xlu1 %3314 }
 0x6f3   :  { %3155 = vmatpush3.bf16.msra.mxu0 %v3154_v6 }
 0x6f4   :  { %v2076_v2 = vrot.slane %v2075_v13, 2  ;;  %v2083_v7 = vadd.f32 %v2082_v1, %v2081_v30  ;;  %3156 = vmatprep.subr.bf16.mxu0 %v3595_v55  ;;  %v3317_v30 = vunpack.i.h.bf16 %v3315_v29 }
 0x6f6   :  { %v2077_v8 = vadd.f32 %v2076_v2, %v2075_v13  ;;  %v2084_v11 = vrot.slane %v2083_v7, 2  ;;  %v3316_v13 = vunpack.i.l.bf16 %v3315_v29  ;;  %v2341_v2 = vld [vmem:[%s4218_s2 + $0x3] ss:$0 sm:$0xff] }
 0x6f8   :  { %v2078_v12 = vrot.slane %v2077_v8, 1  ;;  %v2085_v18 = vadd.f32 %v2084_v11, %v2083_v7  ;;  %v3160_v1 = vpack.c.bf16 %v3317_v30, %v3316_v13 }
 0x6fa   :  { %v2086_v19 = vrot.slane %v2085_v18, 1  ;;  %v2079_v24 = vadd.f32 %v2078_v12, %v2077_v8 }
 0x6fc   :  { %v2087_v25 = vadd.f32 %v2086_v19, %v2085_v18 }
 0x6fe   :  { %v2088_v34 = vsel %vm668_vm1, %v2079_v24, %v2087_v25 }
 0x6ff   :  { %2968 = vmatmul.mubr.f32.vlgmr.msra.gmra.mrb[16].mxu1 %v2088_v34 }
 0x700   :  { %2978 = vmatprep.mubr.msk.f32.mxu1 %vm3597_vm4, %v3593_v32  ;;  %3146 = vmatpush3.bf16.msra.mxu1 %v3145_v41 }
 0x701   :  { %3147 = vmatprep.subr.bf16.mxu1 %v3595_v55 }
 0x704   :  { %3149 = vmatpush3.bf16.msra.mxu1 %v3148_v57 }
 0x705   :  { %2981 = vmatprep.subr.bf16.mxu1 %v3593_v32 }
 0x7d2   :  { %v2219_v58 = vpop.f32.mrb[16].mxu1 }
 0x7d3   :  { %v2223_v0 = vmul.f32 0.125, %v2219_v58  ;;  %v2969_v21 = vpop.f32.mrb[17].mxu1 }
 0x7d5   :  { %v2224_v3 = vmul.f32 %v2223_v0, %v2223_v0  ;;  %v2232_v37 = vsub.f32 0.0, %v2223_v0 }
 0x7d7   :  { %v2226_v9 = vrot.slane %v2224_v3, 7 }
 0x7d9   :  { %v2228_v28 = vsub.f32 %v2223_v0, %v2226_v9 }
 0x7db   :  { %v2229_v20 = vmax.f32 %v2228_v28, 0.0 }
 0x7dd   :  { %v2230_v27 = vadd.f32 1e-05, %v2229_v20 }
 0x7df   :  { %3538 = vrsqrt.f32 %v2230_v27 }
 0x7e9   :  { %v3539_v33 = vpop.eup %3538 }
 0x7ea   :  { %v2234_v38 = vrot.slane %v3539_v33, 1 }
 0x7ec   :  { %v2236_v42 = vmul.f32 %v2234_v38, %v2232_v37 }
 0x7ee   :  { %v2238_v45 = vrot.slane %v2236_v42, 7 }
 0x7f0   :  { %v2240_v50 = vsel %vm668_vm1, %v2234_v38, %v2238_v45 }
 0x7f1   :  { %2979 = vmatmul.mubr.msk.f32.vlgmr.msra.gmra.mrb[18].mxu1 %vm2241_vm5, %v2240_v50 }
 0x7f2   :  { %2982 = vmatpush3.bf16.msra.mxu1 %v3526_v48  ;;  %2997 = vmatprep.mubr.msk.bf16.mxu1 %vm3597_vm4, %v3593_v32 }
 0x7f3   :  { %2983 = vmatprep.subr.bf16.mxu1 %v3593_v32 }
 0x7f6   :  { %2984 = vmatpush3.bf16.msra.mxu1 %v3527_v61 }
 0x7f7   :  { %2985 = vmatprep.subr.bf16.mxu1 %v3593_v32 }
 0x7fa   :  { %2986 = vmatpush3.bf16.msra.mxu1 %v3528_v56 }
 0x7fb   :  { %2987 = vmatprep.subr.bf16.mxu1 %v3593_v32 }
 0x7fe   :  { %2988 = vmatpush3.bf16.msra.mxu1 %v3529_v47 }
 0x7ff   :  { %2989 = vmatprep.subr.bf16.mxu1 %v3593_v32 }
 0x802   :  { %2990 = vmatpush3.bf16.msra.mxu1 %v3530_v44 }
 0x803   :  { %2991 = vmatprep.subr.bf16.mxu1 %v3593_v32 }
 0x806   :  { %2992 = vmatpush3.bf16.msra.mxu1 %v3531_v31 }
 0x807   :  { %2993 = vmatprep.subr.bf16.mxu1 %v3593_v32 }
 0x80a   :  { %2994 = vmatpush3.bf16.msra.mxu1 %v3532_v39 }
 0x80b   :  { %2995 = vmatprep.subr.bf16.mxu1 %v3593_v32 }
 0x80e   :  { %2996 = vmatpush3.bf16.msra.mxu1 %v3533_v51 }
 0x8c4   :  { %v2311_v49 = vpop.f32.mrb[18].mxu1 }
 0x8c5   :  { %v2318_v54 = vrot.slane %v2311_v49, %v4241_v46  ;;  %v2980_v59 = vpop.f32.mrb[19].mxu1  ;;  %v2323_v14 = vrot.slane %v2311_v49, %v4243_v10  ;;  %v2485_v49 = vld [vmem:[%s4218_s2 + $0x4] ss:$0 sm:$0xff] }
 0x8c7   :  { %v2319_v60 = vmul.f32 %v2318_v54, %v4150_v5  ;;  %v3157_v5 = vpack.c.bf16 %v3312_v23, %v3311_v26 }
 0x8c9   :  { %v2324_v32 = vadd.f32 %v2323_v14, %v2319_v60  ;;  %3158 = vmatpush3.bf16.msra.mxu0 %v3157_v5 }
 0x8ca   :  { %3159 = vmatprep.subr.bf16.mxu0 %v3595_v55 }
 0x8cb   :  { %v2342_v4 = vpack.c.bf16 %v2324_v32, %v2324_v32 }
 0x8cd   :  { %2998 = vmatmul.mubr.bf16.vlgmr.msra.gmra.mrb[20].mxu1 %v2342_v4  ;;  %3161 = vmatpush3.bf16.msra.mxu0 %v3160_v1 }
 0x9a0   :  { %v2425_v7 = vpop.f32.mrb[20].mxu1 }
 0x9a1   :  { %v2426_v8 = vadd.f32 %v2425_v7, %v2341_v2  ;;  %v2999_v11 = vpop.f32.mrb[21].mxu1 }
 0x9a2   :  { %v2428_v12 = vpop.f32.mrb[22].mxu1 }
 0x9a3   :  { %v2431_v18 = vmax.f32 %v2426_v8, 0.0  ;;  %v3000_v19 = vpop.f32.mrb[23].mxu1 }
 0x9a5   :  { %v2433_v24 = vsel %vm2432_vm6, %v2431_v18, 0.0  ;;  %v2440_v25 = vmul.f32 %v2431_v18, %v2431_v18 }
 0x9a6   :  { %v2434_v34 = vrot.slane %v2433_v24, 4 }
 0x9a7   :  { %v2441_v35 = vsel %vm2432_vm6, %v2440_v25, 0.0 }
 0x9a8   :  { %v2435_v40 = vadd.f32 %v2434_v34, %v2433_v24  ;;  %v2442_v41 = vrot.slane %v2441_v35, 4 }
 0x9aa   :  { %v2436_v55 = vrot.slane %v2435_v40, 2  ;;  %v2443_v52 = vadd.f32 %v2442_v41, %v2441_v35 }
 0x9ac   :  { %v2437_v53 = vadd.f32 %v2436_v55, %v2435_v40  ;;  %v2444_v57 = vrot.slane %v2443_v52, 2 }
 0x9ae   :  { %v2438_v58 = vrot.slane %v2437_v53, 1  ;;  %v2445_v0 = vadd.f32 %v2444_v57, %v2443_v52 }
 0x9b0   :  { %v2446_v21 = vrot.slane %v2445_v0, 1  ;;  %v2439_v3 = vadd.f32 %v2438_v58, %v2437_v53 }
 0x9b2   :  { %v2447_v9 = vadd.f32 %v2446_v21, %v2445_v0 }
 0x9b4   :  { %v2448_v28 = vsel %vm668_vm1, %v2439_v3, %v2447_v9 }
 0x9b5   :  { %v2449_v20 = vmul.f32 0.5, %v2448_v28 }
 0x9b7   :  { %v2450_v27 = vmul.f32 %v2449_v20, %v2449_v20  ;;  %v2458_v48 = vsub.f32 0.0, %v2449_v20 }
 0x9b9   :  { %v2452_v33 = vrot.slane %v2450_v27, 7 }
 0x9bb   :  { %v2454_v37 = vsub.f32 %v2449_v20, %v2452_v33 }
 0x9bd   :  { %v2455_v38 = vmax.f32 %v2454_v37, 0.0 }
 0x9bf   :  { %v2456_v42 = vadd.f32 1e-05, %v2455_v38 }
 0x9c1   :  { %3540 = vrsqrt.f32 %v2456_v42 }
 0x9cb   :  { %v3541_v45 = vpop.eup %3540 }
 0x9cc   :  { %v2460_v50 = vrot.slane %v3541_v45, 1 }
 0x9ce   :  { %v2462_v61 = vmul.f32 %v2460_v50, %v2458_v48 }
 0x9d0   :  { %v2464_v56 = vrot.slane %v2462_v61, 7 }
 0x9d2   :  { %v2466_v47 = vsel %vm668_vm1, %v2460_v50, %v2464_v56 }
 0x9d3   :  { %v2470_v44 = vrot.slane %v2466_v47, %v4241_v46  ;;  %v2475_v39 = vrot.slane %v2466_v47, %v4243_v10 }
 0x9d5   :  { %v2471_v31 = vmul.f32 %v2470_v44, %v2431_v18 }
 0x9d7   :  { %v2476_v51 = vadd.f32 %v2475_v39, %v2471_v31 }
 0x9d9   :  { %3018 = vmatmul.mubr.msk.f32.vlgmr.msra.gmra.mrb[12].mxu0 %vm2518_vm7, %v2476_v51 }
 0xaac   :  { %v2588_v54 = vpop.f32.mrb[12].mxu0 }
 0xaad   :  { %v2589_v59 = vadd.f32 %v2588_v54, %v2485_v49  ;;  %v3019_v60 = vpop.f32.mrb[13].mxu0 }
 0xaaf   :  { %2593 = vst.msk [vmem:[#allocation5] sm:$0x3] %vm2592_vm8, %v2589_v59 }
 0xab0   :  { %3575 = shalt.err (!%p3572_p12)
}
 0xab1   :  { %s3576_s8 = scalar_lea.hbm %s4220_s4, 32 }
 0xab2   :  { %p3577_p13 = scmp.ne.s32.totalorder %s4220_s4, %s3576_s8  ;;  %p3580_p0 = scmp.lt.u32.totalorder %s3576_s8, %s4220_s4 }
 0xab4   :  { %p3582_p1 = pnand %p3580_p0, %p3577_p13 }
 0xab6   :  { %3585 = shalt.err (!%p3582_p1)
}
 0xab7   :  { %2603 = dma.vmem_to_hbm [thread:$0]  %s2601_s30, 32, %s4220_s4, [#allocation4]  }
 0xab8   :  { %3588 = dma.done.wait [#allocation4], 32  }
 0xab9   :  { %3589 = vsyncadd [#allocation4], 4294967264 }
 0xaba   :  { %2607 = vsyncpa [#allocation3], 1 }
 0xabb   :  { %2608 = vsyncpa [#allocation4], 1 }

</bundles_post_ra>
